<compile_context>
chip_gen: v7x
topology: tpu7x:2x2x1
jax: 0.10.0
libtpu: 0.0.40
codegen_flags: <defaults>
</compile_context>

<pallas_src>
import jax
import jax.numpy as jnp
from jax.experimental import pallas as pl
from jax.experimental.pallas import tpu as pltpu

KH = KW = 3   # 3x3 conv, stride 1, padding 1 (pycls conv2d default for ResStemCifar)


def _pick_nb(n, hw, target_rows=8192):
    """Images per grid step: largest divisor of n with nb*hw <= target_rows rows,
    keeping grid length >= 2 when n >= 2 so both v7x TensorCores get work."""
    best = 1
    for nb in range(1, n + 1):
        if n % nb:
            continue
        if nb * hw > target_rows:
            continue
        if n >= 2 and n // nb < 2:
            continue
        best = nb
    return best


def stem_kernel(x_ref, w_ref, bias_ref, o_ref):
    """One grid step = nb images; in-kernel im2col via 9 shifted matmuls.

    x_ref:    (nb, H+2, W+2, Cin)  bf16 halo-padded NHWC activations
    w_ref:    (9, Cin, Cout)       bf16 conv weights (BN scale already folded in)
    bias_ref: (1, Cout)            f32 folded BN bias (beta - mean*scale)
    o_ref:    (nb*H*W, Cout)       bf16 output rows (flattened M, unpadded Cout)
    """
    nb, hp, wp, cin = x_ref.shape
    H, W = hp - 2, wp - 2
    cout = o_ref.shape[-1]
    m = nb * H * W

    acc = jnp.zeros((m, cout), jnp.float32)
    for kh in range(KH):
        for kw in range(KW):
            # Static shifted window; merging (nb, H, W) -> M is a free layout merge
            # for the CIFAR-style spatial sizes used here (W a multiple of 16).
            tap = x_ref[:, kh:kh + H, kw:kw + W, :].reshape(m, cin)
            acc = acc + jnp.dot(tap, w_ref[kh * KW + kw],
                                preferred_element_type=jnp.float32)

    y = jnp.maximum(acc + bias_ref[...], 0.0)     # fused BN bias + ReLU epilogue (f32)
    o_ref[...] = y.astype(o_ref.dtype)


def res_stem_cifar(x_nchw, w_oihw, gamma, beta, running_mean, running_var, eps=1e-5):
    """Forward pass of ResStemCifar. x_nchw: (N, Cin, H, W) -> (N, Cout, H, W)."""
    N, Cin, H, W = x_nchw.shape
    Cout = w_oihw.shape[0]
    HW = H * W

    # ---- cheap wrapper glue: layout + halo pad (bf16), BN folding into weights ----
    x = jnp.transpose(x_nchw, (0, 2, 3, 1)).astype(jnp.bfloat16)        # NHWC, bf16 first
    xp = jnp.pad(x, ((0, 0), (1, 1), (1, 1), (0, 0)))                   # conv pad=1 halo

    inv_std = 1.0 / jnp.sqrt(running_var.astype(jnp.float32) + eps)
    scale = gamma.astype(jnp.float32) * inv_std                          # (Cout,)
    bias = (beta.astype(jnp.float32)
            - running_mean.astype(jnp.float32) * scale).reshape(1, Cout)  # f32

    w = w_oihw.astype(jnp.float32) * scale[:, None, None, None]          # fold BN scale
    w = jnp.transpose(w, (2, 3, 1, 0)).reshape(KH * KW, Cin, Cout)       # OIHW -> (9,Cin,Cout)
    w = w.astype(jnp.bfloat16)

    nb = _pick_nb(N, HW)
    grid = (N // nb,)

    out = pl.pallas_call(
        stem_kernel,
        out_shape=jax.ShapeDtypeStruct((N * HW, Cout), jnp.bfloat16),
        grid=grid,
        in_specs=[
            pl.BlockSpec((nb, H + 2, W + 2, Cin), lambda i: (i, 0, 0, 0)),
            pl.BlockSpec((KH * KW, Cin, Cout), lambda i: (0, 0, 0)),
            pl.BlockSpec((1, Cout), lambda i: (0, 0)),
        ],
        out_specs=pl.BlockSpec((nb * HW, Cout), lambda i: (i, 0)),
        compiler_params=pltpu.CompilerParams(
            dimension_semantics=("parallel",),
            vmem_limit_bytes=32 * 1024 * 1024,   # safe on v5e/v6e/v7x; blocks are small
        ),
    )(xp, w, bias)

    out = out.reshape(N, H, W, Cout).astype(jnp.float32)                 # bf16 -> f32
    return jnp.transpose(out, (0, 3, 1, 2))                              # back to NCHW


def _reference(x_nchw, w_oihw, gamma, beta, running_mean, running_var, eps=1e-5):
    """Plain-JAX f32 reference (conv + eval BN + ReLU) for a correctness check."""
    y = jax.lax.conv_general_dilated(
        x_nchw, w_oihw, window_strides=(1, 1), padding=((1, 1), (1, 1)),
        dimension_numbers=("NCHW", "OIHW", "NCHW"))
    inv_std = 1.0 / jnp.sqrt(running_var + eps)
    s = (gamma * inv_std)[None, :, None, None]
    b = (beta - running_mean * gamma * inv_std)[None, :, None, None]
    return jnp.maximum(y * s + b, 0.0)


if __name__ == "__main__":
    # Small shapes consistent with the module: batch=2, w_in=4, spatial=16x16, w_out=32.
    N, W_IN, H, W, W_OUT = 2, 4, 16, 16, 32

    key = jax.random.PRNGKey(0)
    k_x, k_w, k_g, k_b, k_m, k_v = jax.random.split(key, 6)

    x = jax.random.normal(k_x, (N, W_IN, H, W), dtype=jnp.float32)
    conv_w = jax.random.normal(k_w, (W_OUT, W_IN, KH, KW), dtype=jnp.float32) * 0.1
    gamma = 1.0 + 0.1 * jax.random.normal(k_g, (W_OUT,), dtype=jnp.float32)
    beta = 0.1 * jax.random.normal(k_b, (W_OUT,), dtype=jnp.float32)
    running_mean = 0.1 * jax.random.normal(k_m, (W_OUT,), dtype=jnp.float32)
    running_var = jnp.abs(jax.random.normal(k_v, (W_OUT,), dtype=jnp.float32)) + 0.5

    out = res_stem_cifar(x, conv_w, gamma, beta, running_mean, running_var)
    out = jax.block_until_ready(out)

    ref = _reference(x, conv_w, gamma, beta, running_mean, running_var)
    assert out.shape == (N, W_OUT, H, W), out.shape
    # Tolerance loosened vs pure f32 because the GEMM operands and output are bf16.
    assert jnp.allclose(out, ref, atol=5e-2, rtol=5e-2), "Pallas result mismatch vs reference"

    print("KERNEL_OK")
</pallas_src>

<mosaic_0001>
module attributes {stable_mosaic.version = 11 : i64} {
  func.func @stem_kernel(%arg0: i32, %arg1: memref<1x18x18x4xbf16, #tpu.memory_space<vmem>>, %arg2: memref<9x4x32xbf16, #tpu.memory_space<vmem>>, %arg3: memref<1x32xf32, #tpu.memory_space<vmem>>, %arg4: memref<256x32xbf16, #tpu.memory_space<vmem>>) attributes {dimension_semantics = [#tpu.dimension_semantics<parallel>], iteration_bounds = array<i64: 2>, scalar_prefetch = 0 : i64, scratch_operands = 0 : i64, tpu.core_type = #tpu.core_type<tc>, window_params = [{transform_indices = @transform_0, window_bounds = array<i64: 1, 18, 18, 4>}, {pipeline_mode = #tpu.pipeline_mode<synchronous>, transform_indices = @transform_1, window_bounds = array<i64: 9, 4, 32>}, {pipeline_mode = #tpu.pipeline_mode<synchronous>, transform_indices = @transform_2, window_bounds = array<i64: 1, 32>}, {transform_indices = @transform_3, window_bounds = array<i64: 256, 32>}]} {
    %cst = arith.constant 0.000000e+00 : f32
    %0 = vector.broadcast %cst : f32 to vector<256x32xf32>
    %c0 = arith.constant 0 : index
    %c0_0 = arith.constant 0 : index
    %c0_1 = arith.constant 0 : index
    %c0_2 = arith.constant 0 : index
    %1 = vector.load %arg1[%c0, %c0_0, %c0_1, %c0_2] : memref<1x18x18x4xbf16, #tpu.memory_space<vmem>>, vector<1x16x16x4xbf16>
    %2 = vector.shape_cast %1 : vector<1x16x16x4xbf16> to vector<256x4xbf16>
    %c0_3 = arith.constant 0 : index
    %c0_4 = arith.constant 0 : index
    %c0_5 = arith.constant 0 : index
    %3 = vector.load %arg2[%c0_3, %c0_4, %c0_5] : memref<9x4x32xbf16, #tpu.memory_space<vmem>>, vector<1x4x32xbf16>
    %4 = vector.shape_cast %3 : vector<1x4x32xbf16> to vector<4x32xbf16>
    %cst_6 = arith.constant dense<0.000000e+00> : vector<256x32xf32>
    %5 = tpu.matmul %2, %4, %cst_6 {dimension_numbers = #tpu.dot_dimension_numbers<[1], [0], [0], [1], [0, 0, 1, 1], [], []>} : vector<256x4xbf16>, vector<4x32xbf16>, vector<256x32xf32> -> vector<256x32xf32>
    %6 = arith.addf %0, %5 : vector<256x32xf32>
    %c0_7 = arith.constant 0 : index
    %c0_8 = arith.constant 0 : index
    %c1 = arith.constant 1 : index
    %c0_9 = arith.constant 0 : index
    %7 = vector.load %arg1[%c0_7, %c0_8, %c1, %c0_9] : memref<1x18x18x4xbf16, #tpu.memory_space<vmem>>, vector<1x16x16x4xbf16>
    %8 = vector.shape_cast %7 : vector<1x16x16x4xbf16> to vector<256x4xbf16>
    %c1_10 = arith.constant 1 : index
    %c0_11 = arith.constant 0 : index
    %c0_12 = arith.constant 0 : index
    %9 = vector.load %arg2[%c1_10, %c0_11, %c0_12] : memref<9x4x32xbf16, #tpu.memory_space<vmem>>, vector<1x4x32xbf16>
    %10 = vector.shape_cast %9 : vector<1x4x32xbf16> to vector<4x32xbf16>
    %cst_13 = arith.constant dense<0.000000e+00> : vector<256x32xf32>
    %11 = tpu.matmul %8, %10, %cst_13 {dimension_numbers = #tpu.dot_dimension_numbers<[1], [0], [0], [1], [0, 0, 1, 1], [], []>} : vector<256x4xbf16>, vector<4x32xbf16>, vector<256x32xf32> -> vector<256x32xf32>
    %12 = arith.addf %6, %11 : vector<256x32xf32>
    %c0_14 = arith.constant 0 : index
    %c0_15 = arith.constant 0 : index
    %c2 = arith.constant 2 : index
    %c0_16 = arith.constant 0 : index
    %13 = vector.load %arg1[%c0_14, %c0_15, %c2, %c0_16] : memref<1x18x18x4xbf16, #tpu.memory_space<vmem>>, vector<1x16x16x4xbf16>
    %14 = vector.shape_cast %13 : vector<1x16x16x4xbf16> to vector<256x4xbf16>
    %c2_17 = arith.constant 2 : index
    %c0_18 = arith.constant 0 : index
    %c0_19 = arith.constant 0 : index
    %15 = vector.load %arg2[%c2_17, %c0_18, %c0_19] : memref<9x4x32xbf16, #tpu.memory_space<vmem>>, vector<1x4x32xbf16>
    %16 = vector.shape_cast %15 : vector<1x4x32xbf16> to vector<4x32xbf16>
    %cst_20 = arith.constant dense<0.000000e+00> : vector<256x32xf32>
    %17 = tpu.matmul %14, %16, %cst_20 {dimension_numbers = #tpu.dot_dimension_numbers<[1], [0], [0], [1], [0, 0, 1, 1], [], []>} : vector<256x4xbf16>, vector<4x32xbf16>, vector<256x32xf32> -> vector<256x32xf32>
    %18 = arith.addf %12, %17 : vector<256x32xf32>
    %c0_21 = arith.constant 0 : index
    %c1_22 = arith.constant 1 : index
    %c0_23 = arith.constant 0 : index
    %c0_24 = arith.constant 0 : index
    %19 = vector.load %arg1[%c0_21, %c1_22, %c0_23, %c0_24] : memref<1x18x18x4xbf16, #tpu.memory_space<vmem>>, vector<1x16x16x4xbf16>
    %20 = vector.shape_cast %19 : vector<1x16x16x4xbf16> to vector<256x4xbf16>
    %c3 = arith.constant 3 : index
    %c0_25 = arith.constant 0 : index
    %c0_26 = arith.constant 0 : index
    %21 = vector.load %arg2[%c3, %c0_25, %c0_26] : memref<9x4x32xbf16, #tpu.memory_space<vmem>>, vector<1x4x32xbf16>
    %22 = vector.shape_cast %21 : vector<1x4x32xbf16> to vector<4x32xbf16>
    %cst_27 = arith.constant dense<0.000000e+00> : vector<256x32xf32>
    %23 = tpu.matmul %20, %22, %cst_27 {dimension_numbers = #tpu.dot_dimension_numbers<[1], [0], [0], [1], [0, 0, 1, 1], [], []>} : vector<256x4xbf16>, vector<4x32xbf16>, vector<256x32xf32> -> vector<256x32xf32>
    %24 = arith.addf %18, %23 : vector<256x32xf32>
    %c0_28 = arith.constant 0 : index
    %c1_29 = arith.constant 1 : index
    %c1_30 = arith.constant 1 : index
    %c0_31 = arith.constant 0 : index
    %25 = vector.load %arg1[%c0_28, %c1_29, %c1_30, %c0_31] : memref<1x18x18x4xbf16, #tpu.memory_space<vmem>>, vector<1x16x16x4xbf16>
    %26 = vector.shape_cast %25 : vector<1x16x16x4xbf16> to vector<256x4xbf16>
    %c4 = arith.constant 4 : index
    %c0_32 = arith.constant 0 : index
    %c0_33 = arith.constant 0 : index
    %27 = vector.load %arg2[%c4, %c0_32, %c0_33] : memref<9x4x32xbf16, #tpu.memory_space<vmem>>, vector<1x4x32xbf16>
    %28 = vector.shape_cast %27 : vector<1x4x32xbf16> to vector<4x32xbf16>
    %cst_34 = arith.constant dense<0.000000e+00> : vector<256x32xf32>
    %29 = tpu.matmul %26, %28, %cst_34 {dimension_numbers = #tpu.dot_dimension_numbers<[1], [0], [0], [1], [0, 0, 1, 1], [], []>} : vector<256x4xbf16>, vector<4x32xbf16>, vector<256x32xf32> -> vector<256x32xf32>
    %30 = arith.addf %24, %29 : vector<256x32xf32>
    %c0_35 = arith.constant 0 : index
    %c1_36 = arith.constant 1 : index
    %c2_37 = arith.constant 2 : index
    %c0_38 = arith.constant 0 : index
    %31 = vector.load %arg1[%c0_35, %c1_36, %c2_37, %c0_38] : memref<1x18x18x4xbf16, #tpu.memory_space<vmem>>, vector<1x16x16x4xbf16>
    %32 = vector.shape_cast %31 : vector<1x16x16x4xbf16> to vector<256x4xbf16>
    %c5 = arith.constant 5 : index
    %c0_39 = arith.constant 0 : index
    %c0_40 = arith.constant 0 : index
    %33 = vector.load %arg2[%c5, %c0_39, %c0_40] : memref<9x4x32xbf16, #tpu.memory_space<vmem>>, vector<1x4x32xbf16>
    %34 = vector.shape_cast %33 : vector<1x4x32xbf16> to vector<4x32xbf16>
    %cst_41 = arith.constant dense<0.000000e+00> : vector<256x32xf32>
    %35 = tpu.matmul %32, %34, %cst_41 {dimension_numbers = #tpu.dot_dimension_numbers<[1], [0], [0], [1], [0, 0, 1, 1], [], []>} : vector<256x4xbf16>, vector<4x32xbf16>, vector<256x32xf32> -> vector<256x32xf32>
    %36 = arith.addf %30, %35 : vector<256x32xf32>
    %c0_42 = arith.constant 0 : index
    %c2_43 = arith.constant 2 : index
    %c0_44 = arith.constant 0 : index
    %c0_45 = arith.constant 0 : index
    %37 = vector.load %arg1[%c0_42, %c2_43, %c0_44, %c0_45] : memref<1x18x18x4xbf16, #tpu.memory_space<vmem>>, vector<1x16x16x4xbf16>
    %38 = vector.shape_cast %37 : vector<1x16x16x4xbf16> to vector<256x4xbf16>
    %c6 = arith.constant 6 : index
    %c0_46 = arith.constant 0 : index
    %c0_47 = arith.constant 0 : index
    %39 = vector.load %arg2[%c6, %c0_46, %c0_47] : memref<9x4x32xbf16, #tpu.memory_space<vmem>>, vector<1x4x32xbf16>
    %40 = vector.shape_cast %39 : vector<1x4x32xbf16> to vector<4x32xbf16>
    %cst_48 = arith.constant dense<0.000000e+00> : vector<256x32xf32>
    %41 = tpu.matmul %38, %40, %cst_48 {dimension_numbers = #tpu.dot_dimension_numbers<[1], [0], [0], [1], [0, 0, 1, 1], [], []>} : vector<256x4xbf16>, vector<4x32xbf16>, vector<256x32xf32> -> vector<256x32xf32>
    %42 = arith.addf %36, %41 : vector<256x32xf32>
    %c0_49 = arith.constant 0 : index
    %c2_50 = arith.constant 2 : index
    %c1_51 = arith.constant 1 : index
    %c0_52 = arith.constant 0 : index
    %43 = vector.load %arg1[%c0_49, %c2_50, %c1_51, %c0_52] : memref<1x18x18x4xbf16, #tpu.memory_space<vmem>>, vector<1x16x16x4xbf16>
    %44 = vector.shape_cast %43 : vector<1x16x16x4xbf16> to vector<256x4xbf16>
    %c7 = arith.constant 7 : index
    %c0_53 = arith.constant 0 : index
    %c0_54 = arith.constant 0 : index
    %45 = vector.load %arg2[%c7, %c0_53, %c0_54] : memref<9x4x32xbf16, #tpu.memory_space<vmem>>, vector<1x4x32xbf16>
    %46 = vector.shape_cast %45 : vector<1x4x32xbf16> to vector<4x32xbf16>
    %cst_55 = arith.constant dense<0.000000e+00> : vector<256x32xf32>
    %47 = tpu.matmul %44, %46, %cst_55 {dimension_numbers = #tpu.dot_dimension_numbers<[1], [0], [0], [1], [0, 0, 1, 1], [], []>} : vector<256x4xbf16>, vector<4x32xbf16>, vector<256x32xf32> -> vector<256x32xf32>
    %48 = arith.addf %42, %47 : vector<256x32xf32>
    %c0_56 = arith.constant 0 : index
    %c2_57 = arith.constant 2 : index
    %c2_58 = arith.constant 2 : index
    %c0_59 = arith.constant 0 : index
    %49 = vector.load %arg1[%c0_56, %c2_57, %c2_58, %c0_59] : memref<1x18x18x4xbf16, #tpu.memory_space<vmem>>, vector<1x16x16x4xbf16>
    %50 = vector.shape_cast %49 : vector<1x16x16x4xbf16> to vector<256x4xbf16>
    %c8 = arith.constant 8 : index
    %c0_60 = arith.constant 0 : index
    %c0_61 = arith.constant 0 : index
    %51 = vector.load %arg2[%c8, %c0_60, %c0_61] : memref<9x4x32xbf16, #tpu.memory_space<vmem>>, vector<1x4x32xbf16>
    %52 = vector.shape_cast %51 : vector<1x4x32xbf16> to vector<4x32xbf16>
    %cst_62 = arith.constant dense<0.000000e+00> : vector<256x32xf32>
    %53 = tpu.matmul %50, %52, %cst_62 {dimension_numbers = #tpu.dot_dimension_numbers<[1], [0], [0], [1], [0, 0, 1, 1], [], []>} : vector<256x4xbf16>, vector<4x32xbf16>, vector<256x32xf32> -> vector<256x32xf32>
    %54 = arith.addf %48, %53 : vector<256x32xf32>
    %c0_63 = arith.constant 0 : index
    %c0_64 = arith.constant 0 : index
    %55 = vector.load %arg3[%c0_63, %c0_64] : memref<1x32xf32, #tpu.memory_space<vmem>>, vector<1x32xf32>
    %56 = vector.broadcast %55 : vector<1x32xf32> to vector<256x32xf32>
    %57 = arith.addf %54, %56 : vector<256x32xf32>
    %cst_65 = arith.constant 0.000000e+00 : f32
    %58 = vector.broadcast %cst_65 : f32 to vector<256x32xf32>
    %59 = arith.maximumf %57, %58 : vector<256x32xf32>
    %60 = arith.truncf %59 : vector<256x32xf32> to vector<256x32xbf16>
    %c0_66 = arith.constant 0 : index
    %c0_67 = arith.constant 0 : index
    %61 = vector.load %arg4[%c0_66, %c0_67] : memref<256x32xbf16, #tpu.memory_space<vmem>>, vector<256x32xbf16>
    tpu.vector_store %arg4[%c0_66, %c0_67], %60 {strides = array<i32>} : memref<256x32xbf16, #tpu.memory_space<vmem>>, vector<256x32xbf16>,
    return
  }
  func.func @transform_0(%arg0: i32) -> (i32, i32, i32, i32) {
    %c0_i32 = arith.constant 0 : i32
    %c0_i32_0 = arith.constant 0 : i32
    %c0_i32_1 = arith.constant 0 : i32
    %c0_i32_2 = arith.constant 0 : i32
    return %arg0, %c0_i32, %c0_i32_0, %c0_i32_1 : i32, i32, i32, i32
  }
  func.func @transform_1(%arg0: i32) -> (i32, i32, i32) {
    %c0_i32 = arith.constant 0 : i32
    %c0_i32_0 = arith.constant 0 : i32
    %c0_i32_1 = arith.constant 0 : i32
    %c0_i32_2 = arith.constant 0 : i32
    return %c0_i32, %c0_i32_0, %c0_i32_1 : i32, i32, i32
  }
  func.func @transform_2(%arg0: i32) -> (i32, i32) {
    %c0_i32 = arith.constant 0 : i32
    %c0_i32_0 = arith.constant 0 : i32
    %c0_i32_1 = arith.constant 0 : i32
    return %c0_i32, %c0_i32_0 : i32, i32
  }
  func.func @transform_3(%arg0: i32) -> (i32, i32) {
    %c0_i32 = arith.constant 0 : i32
    %c0_i32_0 = arith.constant 0 : i32
    return %arg0, %c0_i32 : i32, i32
  }
}

</mosaic_0001>

<bundles_post_ra>
// kernel: tpu_custom_call.1
= control target key start
LH: loop header
LB: loop body
LE: loop exit
PB: predicated region body
PF: predicated region fallthrough
CT: control target
= control target key end

     0   :  { %s6500_s12 = smov 0   ;;  %s8343_s0 = inlined_call_operand.vmem [shape: bf16[2,18,18,4], index: 0, kind: input, shape index: {}]   ;;  %s8344_s1 = inlined_call_operand.vmem [shape: bf16[9,4,32], index: 1, kind: input, shape index: {}]   ;;  %s8345_s2 = inlined_call_operand.vmem [shape: f32[1,32], index: 2, kind: input, shape index: {}]   ;;  %s8346_s3 = inlined_call_operand.vmem [shape: bf16[512,32], index: 3, kind: output, shape index: {}]  }
   0x1 LB: > { %s6506_s13 = sadd.s32 4294967295, %s6478_s12   ;;  %p5024_p0 = scmp.ge.s32.totalorder %s6478_s12, 1  ;;  %s6478_s12 = sphi %s6500_s12, %s13_s12  }
   0x2   : > { %p137_p1 = scmp.lt.s32.totalorder %s6478_s12, 3 }
   0x4   : > { %p138_p2 = pnand %p5024_p0, %p137_p1 }
   0x6   : > { %141 = sbr.rel (%p138_p2) target bundleno = 590 (0x24e), region = 32 }
   0xd   : > { %v5028_v0 = vld [vmem:[%s8344_s1 + $0x2] sm:$0x3]  ;;  %vm708_vm0 = vcmask 1041408   ;;  %v5255_v1 = vld [vmem:[%s8344_s1 + $0x8] sm:$0x3]  ;;  %p161_p3 = scmp.lt.s32.totalorder %s6506_s13, 1 }
   0xe   : > { %6348 = vmatprep.subr.msk.bf16.mxu1 %vm708_vm0, %v5028_v0  ;;  %6352 = vmatprep.subr.msk.bf16.mxu0 %vm708_vm0, %v5255_v1  ;;  %v710_v2 = vsel %vm708_vm0, %v5028_v0, 0  ;;  %v6521_v3 = vsel %vm708_vm0, %v5255_v1, 0  ;;  %v205_v4 = vld [vmem:[%s8344_s1] sm:$0x3]  ;;  %v5320_v5 = vld [vmem:[%s8344_s1 + $0xa] sm:$0x3] }
   0xf   : > { %8360 = vst [vmem:[#allocation2_spill] sm:$0xff] %v6521_v3  ;;  %5785 = vmatpush3.bf16.msra.mxu1 %v710_v2  ;;  %5921 = vmatpush3.bf16.msra.mxu0 %v6521_v3  ;;  %s162_s18 = scalar_select %p161_p3, %s6506_s13, 1  ;;  %vm222_vm1 = vsmask.f32 3328  ;;  %vm223_vm2 = vsmask.f32 7440 }
  0x10   : > { %6349 = vmatprep.subr.msk.bf16.mxu1 %vm708_vm0, %v205_v4  ;;  %6354 = vmatprep.subr.msk.bf16.mxu0 %vm708_vm0, %v5320_v5  ;;  %vm659_vm3 = vcmask 31744   ;;  %v6549_v17 = vsel %vm708_vm0, %v205_v4, 0  ;;  %v6555_v26 = vld [vmem:[%s8344_s1 + $0xc] sm:$0x3]  ;;  %vm6562_vm4 = vmor %vm222_vm1, %vm223_vm2  ;;  %v6568_v37 = vsel %vm708_vm0, %v5320_v5, 0  ;;  %vm1213_vm5 = vcmask 1042432  }
  0x11   : > { %s6358_s23 = smul.u32 216, %s162_s18  ;;  %v6572_v41 = vsel %vm708_vm0, %v6555_v26, 0  ;;  %vm1214_vm6 = vcmask 1046532   ;;  %s5026_s16 = sshll.u32 %s6506_s13, 5  ;;  %vm4931_vm8 = vcmask 257024  }
  0x12   : > { %vm6788_vm7 = vmor %vm1213_vm5, %vm1214_vm6  ;;  %p167_p4 = scmp.lt.s32.totalorder %s5026_s16, 63 }
  0x13   : > { %s6536_s26 = scalar_lea.vmem %s8343_s0, %s6358_s23 }
  0x14   : > { %v173_v6 = vld [vmem:[%s6536_s26] sm:$0xf]  ;;  %v174_v7 = vld [vmem:[%s6536_s26 + $0x4] sm:$0xf]  ;;  %v206_v8 = vld [vmem:[%s6536_s26 + $0x8] sm:$0x1] }
  0x15   : > { %v226_v9 = vshrl.u32 %v173_v6, 16  ;;  %v229_v10 = vshll.u32 %v173_v6, 16  ;;  %v235_v11 = vshll.u32 %v174_v7, 16  ;;  %v239_v12 = vshrl.u32 %v174_v7, 16  ;;  %v5207_v13 = vld [vmem:[%s6536_s26 + $0xc] sm:$0xf] }
  0x16   : > { %v245_v14 = vshll.u32 %v206_v8, 16  ;;  %v6543_v15 = vld [vmem:[%s6536_s26 + $0x10] sm:$0xf]  ;;  %v6546_v16 = vld [vmem:[%s6536_s26 + $0x14] sm:$0x1]  ;;  %v2030_v23 = vshrl.u32 %v5207_v13, 16 }
  0x17   : > { %v228_v18 = vrot.slane %v226_v9, 4  ;;  %v231_v19 = vrot.slane %v229_v10, 5  ;;  %v237_v20 = vrot.slane %v235_v11, 5  ;;  %v241_v21 = vrot.slane %v239_v12, 4  ;;  %v175_v31 = vld [vmem:[%s6536_s26 + $0xc] sm:$0xf] }
  0x18   : > { %v247_v22 = vrot.slane %v245_v14, 5  ;;  %v2033_v24 = vshll.u32 %v5207_v13, 16  ;;  %v2039_v25 = vshll.u32 %v6543_v15, 16  ;;  %v2043_v29 = vshrl.u32 %v6543_v15, 16  ;;  %v176_v36 = vld [vmem:[%s6536_s26 + $0x10] sm:$0xf] }
  0x19   : > { %v232_v27 = vor.u32 %v231_v19, %v228_v18  ;;  %v242_v28 = vor.u32 %v241_v21, %v237_v20  ;;  %v2049_v30 = vshll.u32 %v6546_v16, 16  ;;  %v2032_v33 = vrot.slane %v2030_v23, 4  ;;  %v207_v44 = vld [vmem:[%s6536_s26 + $0x14] sm:$0x1]  ;;  %v5210_v55 = vld [vmem:[%s6536_s26 + $0x18] sm:$0xf] }
  0x1a   : > { %v2035_v34 = vrot.slane %v2033_v24, 5  ;;  %v2041_v35 = vrot.slane %v2039_v25, 5  ;;  %v2045_v40 = vrot.slane %v2043_v29, 4  ;;  %v250_v45 = vshrl.u32 %v175_v31, 16  ;;  %v6581_v60 = vld [vmem:[%s6536_s26 + $0x1c] sm:$0xf] }
  0x1b   : > { %v233_v38 = vrot.slane %v232_v27, 4  ;;  %v243_v39 = vrot.slane %v242_v28, 4  ;;  %v2051_v43 = vrot.slane %v2049_v30, 5  ;;  %v253_v46 = vshll.u32 %v175_v31, 16  ;;  %v6589_v1 = vld [vmem:[%s6536_s26 + $0x20] sm:$0x1] }
  0x1c   : > { %v2036_v42 = vor.u32 %v2035_v34, %v2032_v33  ;;  %v2046_v49 = vor.u32 %v2045_v40, %v2041_v35  ;;  %v259_v50 = vshll.u32 %v176_v36, 16  ;;  %v252_v53 = vrot.slane %v250_v45, 4  ;;  %v177_v18 = vld [vmem:[%s6536_s26 + $0x18] sm:$0xf]  ;;  %v178_v23 = vld [vmem:[%s6536_s26 + $0x1c] sm:$0xf] }
  0x1d   : > { %v238_v47 = vsel %vm6562_vm4, %v233_v38, %v237_v20  ;;  %v248_v48 = vsel %vm6562_vm4, %v243_v39, %v247_v22  ;;  %v255_v54 = vrot.slane %v253_v46, 5  ;;  %v263_v58 = vshrl.u32 %v176_v36, 16  ;;  %v208_v31 = vld [vmem:[%s6536_s26 + $0x20] sm:$0x1]  ;;  %v5213_v40 = vld [vmem:[%s6536_s26 + $0x24] sm:$0xf] }
  0x1e   : > { %v5029_v51 = vcombine.low %v238_v47, %v248_v48  ;;  %v2037_v52 = vrot.slane %v2036_v42, 4  ;;  %v2047_v56 = vrot.slane %v2046_v49, 4  ;;  %v261_v57 = vrot.slane %v259_v50, 5  ;;  %v6612_v46 = vld [vmem:[%s6536_s26 + $0x28] sm:$0xf]  ;;  %s8415_s16 = smov (!%p167_p4, %s5026_s16), 63 }
  0x1f   : > { %v269_v59 = vshll.u32 %v207_v44, 16  ;;  %v2773_v62 = vrot.slane %v6543_v15, 5  ;;  %v2776_v63 = vrot.slane %v6546_v16, 5  ;;  %v256_v0 = vor.u32 %v255_v54, %v252_v53  ;;  %v6621_v54 = vld [vmem:[%s6536_s26 + $0x2c] sm:$0x1]  ;;  %s5027_s13 = sshll.u32 %s8415_s16, 2 }
  0x20   : > { %5786 = vmatprep.mubr.msk.bf16.mxu1 %vm659_vm3, %v5029_v51  ;;  %v2042_v61 = vsel %vm6562_vm4, %v2037_v52, %v2041_v35  ;;  %v2052_v2 = vsel %vm6562_vm4, %v2047_v56, %v2051_v43  ;;  %v265_v4 = vrot.slane %v263_v58, 4  ;;  %v2054_v6 = vshrl.u32 %v5210_v55, 16  ;;  %v5109_v51 = vld [vmem:[%s8344_s1 + $0x4] sm:$0x3]  ;;  %v6821_v16 = vld [vmem:[%s6536_s26 + $0x7c] sm:$0xf]  ;;  %s8238_s21 = scalar_lea.vmem %s8346_s3, %s5027_s13 }
  0x21   : > { %v271_v5 = vrot.slane %v269_v59, 5  ;;  %v5256_v7 = vcombine.low %v2042_v61, %v2052_v2  ;;  %v257_v8 = vrot.slane %v256_v0, 4  ;;  %v2057_v9 = vshll.u32 %v5210_v55, 16  ;;  %v179_v0 = vld [vmem:[%s6536_s26 + $0x24] sm:$0xf] }
  0x22   : > { %v2063_v10 = vshll.u32 %v6581_v60, 16  ;;  %v266_v11 = vor.u32 %v265_v4, %v261_v57  ;;  %v2056_v12 = vrot.slane %v2054_v6, 4  ;;  %v2067_v13 = vshrl.u32 %v6581_v60, 16 }
  0x23   : > { %v2073_v14 = vshll.u32 %v6589_v1, 16  ;;  %5922 = vmatprep.mubr.msk.bf16.mxu0 %vm659_vm3, %v5256_v7  ;;  %v262_v19 = vsel %vm6562_vm4, %v257_v8, %v261_v57  ;;  %v2059_v20 = vrot.slane %v2057_v9, 5  ;;  %v2780_v22 = vrot.slane %v6581_v60, 5  ;;  %v180_v7 = vld [vmem:[%s6536_s26 + $0x28] sm:$0xf] }
  0x24   : > { %v2065_v21 = vrot.slane %v2063_v10, 5  ;;  %v267_v24 = vrot.slane %v266_v11, 4  ;;  %v2069_v25 = vrot.slane %v2067_v13, 4  ;;  %v2783_v28 = vrot.slane %v6589_v1, 5  ;;  %v209_v13 = vld [vmem:[%s6536_s26 + $0x2c] sm:$0x1] }
  0x25   : > { %v2075_v27 = vrot.slane %v2073_v14, 5  ;;  %v2060_v29 = vor.u32 %v2059_v20, %v2056_v12  ;;  %v6605_v30 = vrot.slane %v2780_v22, 4  ;;  %v274_v33 = vshrl.u32 %v177_v18, 16 }
  0x26   : > { %v277_v34 = vshll.u32 %v177_v18, 16  ;;  %v272_v35 = vsel %vm6562_vm4, %v267_v24, %v271_v5  ;;  %v2070_v36 = vor.u32 %v2069_v25, %v2065_v21  ;;  %v283_v38 = vshll.u32 %v178_v23, 16  ;;  %v5216_v24 = vld [vmem:[%s6536_s26 + $0x30] sm:$0xf] }
  0x27   : > { %v287_v39 = vshrl.u32 %v178_v23, 16  ;;  %v5030_v42 = vcombine.low %v262_v19, %v272_v35  ;;  %v2061_v43 = vrot.slane %v2060_v29, 4  ;;  %v276_v44 = vrot.slane %v274_v33, 4  ;;  %v6641_v33 = vld [vmem:[%s6536_s26 + $0x34] sm:$0xf] }
  0x28   : > { %v279_v45 = vrot.slane %v277_v34, 5  ;;  %v2071_v47 = vrot.slane %v2070_v36, 4  ;;  %v285_v48 = vrot.slane %v283_v38, 5  ;;  %v293_v50 = vshll.u32 %v208_v31, 16 }
  0x29   : > { %v289_v49 = vrot.slane %v287_v39, 4  ;;  %5787 = vmatmul.mubr.msk.bf16.vlgmr.msra.gmra.mrb[0].mxu1 %vm659_vm3, %v5030_v42  ;;  %v2066_v52 = vsel %vm6562_vm4, %v2061_v43, %v2065_v21  ;;  %v2078_v55 = vshrl.u32 %v5213_v40, 16  ;;  %v2081_v56 = vshll.u32 %v5213_v40, 16  ;;  %v6649_v40 = vld [vmem:[%s6536_s26 + $0x38] sm:$0x1] }
  0x2a   : > { %v280_v53 = vor.u32 %v279_v45, %v276_v44  ;;  %5819 = vmatpush3.bf16.msra.mxu1 %v6549_v17  ;;  %v2076_v57 = vsel %vm6562_vm4, %v2071_v47, %v2075_v27  ;;  %v295_v59 = vrot.slane %v293_v50, 5  ;;  %v2087_v61 = vshll.u32 %v6612_v46, 16 }
  0x2b   : > { %v290_v58 = vor.u32 %v289_v49, %v285_v48  ;;  %v5257_v2 = vcombine.low %v2066_v52, %v2076_v57  ;;  %v2080_v5 = vrot.slane %v2078_v55, 4  ;;  %v2083_v6 = vrot.slane %v2081_v56, 5  ;;  %6350 = vmatprep.subr.msk.bf16.mxu1 %vm708_vm0, %v5109_v51  ;;  %v181_v52 = vld [vmem:[%s6536_s26 + $0x30] sm:$0xf] }
  0x2c   : > { %v281_v4 = vrot.slane %v280_v53, 4  ;;  %v2089_v9 = vrot.slane %v2087_v61, 5  ;;  %v2091_v17 = vshrl.u32 %v6612_v46, 16  ;;  %v2097_v10 = vshll.u32 %v6621_v54, 16 }
  0x2d   : > { %v291_v8 = vrot.slane %v290_v58, 4  ;;  %5923 = vmatmul.mubr.msk.bf16.vlgmr.msra.gmra.mrb[0].mxu0 %vm659_vm3, %v5257_v2  ;;  %v2084_v12 = vor.u32 %v2083_v6, %v2080_v5  ;;  %v298_v14 = vshrl.u32 %v179_v0, 16  ;;  %v301_v18 = vshll.u32 %v179_v0, 16  ;;  %v182_v58 = vld [vmem:[%s6536_s26 + $0x34] sm:$0xf] }
  0x2e   : > { %v286_v11 = vsel %vm6562_vm4, %v281_v4, %v285_v48  ;;  %5955 = vmatpush3.bf16.msra.mxu0 %v6568_v37  ;;  %v2093_v20 = vrot.slane %v2091_v17, 4  ;;  %v2099_v21 = vrot.slane %v2097_v10, 5  ;;  %v307_v23 = vshll.u32 %v180_v7, 16  ;;  %v210_v4 = vld [vmem:[%s6536_s26 + $0x38] sm:$0x1] }
  0x2f   : > { %v296_v19 = vsel %vm6562_vm4, %v291_v8, %v295_v59  ;;  %v2085_v27 = vrot.slane %v2084_v12, 4  ;;  %v300_v29 = vrot.slane %v298_v14, 4  ;;  %v303_v31 = vrot.slane %v301_v18, 5  ;;  %6355 = vmatprep.subr.msk.bf16.mxu0 %vm708_vm0, %v6555_v26  ;;  %v5219_v12 = vld [vmem:[%s6536_s26 + $0x3c] sm:$0xf] }
  0x30   : > { %v5031_v25 = vcombine.low %v286_v11, %v296_v19  ;;  %v2094_v34 = vor.u32 %v2093_v20, %v2089_v9  ;;  %v309_v35 = vrot.slane %v307_v23, 5  ;;  %v311_v37 = vshrl.u32 %v180_v7, 16  ;;  %v6666_v20 = vld [vmem:[%s6536_s26 + $0x40] sm:$0xf] }
  0x31   : > { %v317_v36 = vshll.u32 %v209_v13, 16  ;;  %v2090_v38 = vsel %vm6562_vm4, %v2085_v27, %v2089_v9  ;;  %v304_v39 = vor.u32 %v303_v31, %v300_v29  ;;  %v2102_v42 = vshrl.u32 %v5216_v24, 16 }
  0x32   : > { %5790 = vmatprep.mubr.msk.bf16.mxu1 %vm659_vm3, %v5031_v25  ;;  %v2105_v43 = vshll.u32 %v5216_v24, 16  ;;  %v2095_v44 = vrot.slane %v2094_v34, 4  ;;  %v313_v45 = vrot.slane %v311_v37, 4  ;;  %v2111_v26 = vshll.u32 %v6641_v33, 16  ;;  %v6671_v34 = vld [vmem:[%s6536_s26 + $0x44] sm:$0x1] }
  0x33   : > { %v319_v47 = vrot.slane %v317_v36, 5  ;;  %v305_v48 = vrot.slane %v304_v39, 4  ;;  %v2104_v49 = vrot.slane %v2102_v42, 4  ;;  %v2115_v51 = vshrl.u32 %v6641_v33, 16  ;;  %v183_v42 = vld [vmem:[%s6536_s26 + $0x3c] sm:$0xf] }
  0x34   : > { %v2107_v50 = vrot.slane %v2105_v43, 5  ;;  %v2100_v53 = vsel %vm6562_vm4, %v2095_v44, %v2099_v21  ;;  %v314_v55 = vor.u32 %v313_v45, %v309_v35  ;;  %v2113_v56 = vrot.slane %v2111_v26, 5  ;;  %v184_v26 = vld [vmem:[%s6536_s26 + $0x40] sm:$0xf] }
  0x35   : > { %v2121_v57 = vshll.u32 %v6649_v40, 16  ;;  %v5258_v59 = vcombine.low %v2090_v38, %v2100_v53  ;;  %v310_v61 = vsel %vm6562_vm4, %v305_v48, %v309_v35  ;;  %v2117_v2 = vrot.slane %v2115_v51, 4 }
  0x36   : > { %v2108_v0 = vor.u32 %v2107_v50, %v2104_v49  ;;  %v315_v5 = vrot.slane %v314_v55, 4  ;;  %v322_v7 = vshrl.u32 %v181_v52, 16  ;;  %v325_v8 = vshll.u32 %v181_v52, 16 }
  0x37   : > { %v2123_v6 = vrot.slane %v2121_v57, 5  ;;  %5926 = vmatprep.mubr.msk.bf16.mxu0 %vm659_vm3, %v5258_v59  ;;  %v2118_v17 = vor.u32 %v2117_v2, %v2113_v56  ;;  %v331_v10 = vshll.u32 %v182_v58, 16  ;;  %v335_v11 = vshrl.u32 %v182_v58, 16  ;;  %v5222_v2 = vld [vmem:[%s6536_s26 + $0x48] sm:$0xf] }
  0x38   : > { %v2109_v9 = vrot.slane %v2108_v0, 4  ;;  %v320_v13 = vsel %vm6562_vm4, %v315_v5, %v319_v47  ;;  %v324_v14 = vrot.slane %v322_v7, 4  ;;  %v327_v18 = vrot.slane %v325_v8, 5  ;;  %v6689_v8 = vld [vmem:[%s6536_s26 + $0x4c] sm:$0xf] }
  0x39   : > { %v341_v19 = vshll.u32 %v210_v4, 16  ;;  %v5032_v21 = vcombine.low %v310_v61, %v320_v13  ;;  %v2119_v24 = vrot.slane %v2118_v17, 4  ;;  %v333_v25 = vrot.slane %v331_v10, 5  ;;  %v211_v61 = vld [vmem:[%s6536_s26 + $0x44] sm:$0x1] }
  0x3a   : > { %v2114_v23 = vsel %vm6562_vm4, %v2109_v9, %v2113_v56  ;;  %v328_v27 = vor.u32 %v327_v18, %v324_v14  ;;  %v337_v29 = vrot.slane %v335_v11, 4  ;;  %v2126_v35 = vshrl.u32 %v5219_v12, 16 }
  0x3b   : > { %v343_v31 = vrot.slane %v341_v19, 5  ;;  %5791 = vmatmul.mubr.msk.bf16.gmra.mrb[4].mxu1 %vm659_vm3, %v5032_v21  ;;  %v2124_v37 = vsel %vm6562_vm4, %v2119_v24, %v2123_v6  ;;  %v2129_v36 = vshll.u32 %v5219_v12, 16  ;;  %v2135_v38 = vshll.u32 %v6666_v20, 16 }
  0x3c   : > { %v2139_v39 = vshrl.u32 %v6666_v20, 16  ;;  %v5259_v43 = vcombine.low %v2114_v23, %v2124_v37  ;;  %v329_v44 = vrot.slane %v328_v27, 4  ;;  %v338_v45 = vor.u32 %v337_v29, %v333_v25  ;;  %v6697_v23 = vld [vmem:[%s6536_s26 + $0x50] sm:$0x1]  ;;  %v6701_v27 = vld [vmem:[%s6536_s26 + $0x48] sm:$0xf] }
  0x3d   : > { %v2128_v47 = vrot.slane %v2126_v35, 4  ;;  %v2131_v48 = vrot.slane %v2129_v36, 5  ;;  %v2137_v49 = vrot.slane %v2135_v38, 5  ;;  %v2145_v51 = vshll.u32 %v6671_v34, 16  ;;  %v6704_v36 = vld [vmem:[%s6536_s26 + $0x4c] sm:$0xf] }
  0x3e   : > { %v2141_v50 = vrot.slane %v2139_v39, 4  ;;  %5927 = vmatmul.mubr.msk.bf16.gmra.mrb[4].mxu0 %vm659_vm3, %v5259_v43  ;;  %v334_v52 = vsel %vm6562_vm4, %v329_v44, %v333_v25  ;;  %v339_v53 = vrot.slane %v338_v45, 4  ;;  %v346_v55 = vshrl.u32 %v183_v42, 16 }
  0x3f   : > { %v349_v56 = vshll.u32 %v183_v42, 16  ;;  %v2132_v57 = vor.u32 %v2131_v48, %v2128_v47  ;;  %v2147_v59 = vrot.slane %v2145_v51, 5  ;;  %v355_v0 = vshll.u32 %v184_v26, 16 }
  0x40   : > { %v2142_v58 = vor.u32 %v2141_v50, %v2137_v49  ;;  %v344_v4 = vsel %vm6562_vm4, %v339_v53, %v343_v31  ;;  %v348_v5 = vrot.slane %v346_v55, 4  ;;  %v359_v7 = vshrl.u32 %v184_v26, 16  ;;  %v212_v26 = vld [vmem:[%s6536_s26 + $0x50] sm:$0x1]  ;;  %v5225_v53 = vld [vmem:[%s6536_s26 + $0x54] sm:$0xf] }
  0x41   : > { %v351_v6 = vrot.slane %v349_v56, 5  ;;  %v5033_v9 = vcombine.low %v334_v52, %v344_v4  ;;  %v2133_v17 = vrot.slane %v2132_v57, 4  ;;  %v357_v11 = vrot.slane %v355_v0, 5  ;;  %v6720_v4 = vld [vmem:[%s6536_s26 + $0x58] sm:$0xf] }
  0x42   : > { %v2143_v10 = vrot.slane %v2142_v58, 4  ;;  %v361_v13 = vrot.slane %v359_v7, 4  ;;  %v365_v14 = vshll.u32 %v211_v61, 16  ;;  %v2150_v18 = vshrl.u32 %v5222_v2, 16 }
  0x43   : > { %v352_v12 = vor.u32 %v351_v6, %v348_v5  ;;  %5794 = vmatprep.mubr.msk.bf16.mxu1 %vm659_vm3, %v5033_v9  ;;  %v2138_v19 = vsel %vm6562_vm4, %v2133_v17, %v2137_v49  ;;  %v2153_v24 = vshll.u32 %v5222_v2, 16  ;;  %v2159_v25 = vshll.u32 %v6689_v8, 16 }
  0x44   : > { %v2148_v21 = vsel %vm6562_vm4, %v2143_v10, %v2147_v59  ;;  %v362_v35 = vor.u32 %v361_v13, %v357_v11  ;;  %v367_v37 = vrot.slane %v365_v14, 5  ;;  %v2152_v38 = vrot.slane %v2150_v18, 4 }
  0x45   : > { %v5260_v29 = vcombine.low %v2138_v19, %v2148_v21  ;;  %v353_v31 = vrot.slane %v352_v12, 4  ;;  %v2155_v39 = vrot.slane %v2153_v24, 5  ;;  %v2161_v42 = vrot.slane %v2159_v25, 5  ;;  %v6726_v12 = vld [vmem:[%s6536_s26 + $0x5c] sm:$0x1] }
  0x46   : > { %v2163_v43 = vshrl.u32 %v6689_v8, 16  ;;  %v363_v45 = vrot.slane %v362_v35, 4  ;;  %v2169_v47 = vshll.u32 %v6697_v23, 16  ;;  %v370_v48 = vshrl.u32 %v6701_v27, 16  ;;  %v6730_v24 = vld [vmem:[%s6536_s26 + $0x54] sm:$0xf] }
  0x47   : > { %5930 = vmatprep.mubr.msk.bf16.mxu0 %vm659_vm3, %v5260_v29  ;;  %v358_v44 = vsel %vm6562_vm4, %v353_v31, %v357_v11  ;;  %v2156_v49 = vor.u32 %v2155_v39, %v2152_v38  ;;  %v373_v51 = vshll.u32 %v6701_v27, 16  ;;  %v379_v52 = vshll.u32 %v6704_v36, 16 }
  0x48   : > { %v2165_v50 = vrot.slane %v2163_v43, 4  ;;  %v368_v55 = vsel %vm6562_vm4, %v363_v45, %v367_v37  ;;  %v2171_v56 = vrot.slane %v2169_v47, 5  ;;  %v372_v57 = vrot.slane %v370_v48, 4  ;;  %v6736_v37 = vld [vmem:[%s6536_s26 + $0x58] sm:$0xf] }
  0x49   : > { %v383_v58 = vshrl.u32 %v6704_v36, 16  ;;  %v5034_v59 = vcombine.low %v358_v44, %v368_v55  ;;  %v2157_v61 = vrot.slane %v2156_v49, 4  ;;  %v375_v2 = vrot.slane %v373_v51, 5 }
  0x4a   : > { %v2166_v0 = vor.u32 %v2165_v50, %v2161_v42  ;;  %v381_v5 = vrot.slane %v379_v52, 5  ;;  %v389_v7 = vshll.u32 %v212_v26, 16  ;;  %v2174_v9 = vshrl.u32 %v5225_v53, 16  ;;  %v213_v26 = vld [vmem:[%s6536_s26 + $0x5c] sm:$0x1] }
  0x4b   : > { %v385_v6 = vrot.slane %v383_v58, 4  ;;  %5795 = vmatmul.mubr.msk.bf16.gmra.mrb[8].mxu1 %vm659_vm3, %v5034_v59  ;;  %v2162_v17 = vsel %vm6562_vm4, %v2157_v61, %v2161_v42  ;;  %v376_v11 = vor.u32 %v375_v2, %v372_v57  ;;  %v2177_v13 = vshll.u32 %v5225_v53, 16  ;;  %v5228_v53 = vld [vmem:[%s6536_s26 + $0x60] sm:$0xf]  ;;  %v6750_v59 = vld [vmem:[%s6536_s26 + $0x64] sm:$0xf] }
  0x4c   : > { %v2167_v10 = vrot.slane %v2166_v0, 4  ;;  %v391_v18 = vrot.slane %v389_v7, 5  ;;  %v2176_v19 = vrot.slane %v2174_v9, 4  ;;  %v2183_v21 = vshll.u32 %v6720_v4, 16  ;;  %v6757_v9 = vld [vmem:[%s6536_s26 + $0x68] sm:$0x1] }
  0x4d   : > { %v386_v14 = vor.u32 %v385_v6, %v381_v5  ;;  %v377_v29 = vrot.slane %v376_v11, 4  ;;  %v2179_v31 = vrot.slane %v2177_v13, 5  ;;  %v2187_v35 = vshrl.u32 %v6720_v4, 16 }
  0x4e   : > { %v2172_v25 = vsel %vm6562_vm4, %v2167_v10, %v2171_v56  ;;  %v2185_v42 = vrot.slane %v2183_v21, 5  ;;  %v2193_v43 = vshll.u32 %v6726_v12, 16  ;;  %v394_v48 = vshrl.u32 %v6730_v24, 16 }
  0x4f   : > { %v5261_v38 = vcombine.low %v2162_v17, %v2172_v25  ;;  %v387_v39 = vrot.slane %v386_v14, 4  ;;  %v382_v44 = vsel %vm6562_vm4, %v377_v29, %v381_v5  ;;  %v2180_v45 = vor.u32 %v2179_v31, %v2176_v19  ;;  %v6761_v19 = vld [vmem:[%s6536_s26 + $0x60] sm:$0xf] }
  0x50   : > { %v2189_v47 = vrot.slane %v2187_v35, 4  ;;  %v2195_v50 = vrot.slane %v2193_v43, 5  ;;  %v397_v51 = vshll.u32 %v6730_v24, 16  ;;  %v403_v52 = vshll.u32 %v6736_v37, 16  ;;  %v6767_v35 = vld [vmem:[%s6536_s26 + $0x64] sm:$0xf] }
  0x51   : > { %5931 = vmatmul.mubr.msk.bf16.gmra.mrb[8].mxu0 %vm659_vm3, %v5261_v38  ;;  %v392_v49 = vsel %vm6562_vm4, %v387_v39, %v391_v18  ;;  %v2181_v56 = vrot.slane %v2180_v45, 4  ;;  %v396_v58 = vrot.slane %v394_v48, 4  ;;  %v407_v2 = vshrl.u32 %v6736_v37, 16 }
  0x52   : > { %v5035_v55 = vcombine.low %v382_v44, %v392_v49  ;;  %v2190_v57 = vor.u32 %v2189_v47, %v2185_v42  ;;  %v399_v61 = vrot.slane %v397_v51, 5  ;;  %v405_v0 = vrot.slane %v403_v52, 5 }
  0x53   : > { %v413_v5 = vshll.u32 %v213_v26, 16  ;;  %v2186_v6 = vsel %vm6562_vm4, %v2181_v56, %v2185_v42  ;;  %v2198_v17 = vshrl.u32 %v5228_v53, 16  ;;  %v2201_v10 = vshll.u32 %v5228_v53, 16 }
  0x54   : > { %5798 = vmatprep.mubr.msk.bf16.mxu1 %vm659_vm3, %v5035_v55  ;;  %v2191_v7 = vrot.slane %v2190_v57, 4  ;;  %v400_v11 = vor.u32 %v399_v61, %v396_v58  ;;  %v409_v13 = vrot.slane %v407_v2, 4  ;;  %v2207_v18 = vshll.u32 %v6750_v59, 16  ;;  %v5288_v58 = vld [vmem:[%s6536_s26 + $0xc] sm:$0xe] }
  0x55   : > { %v415_v14 = vrot.slane %v413_v5, 5  ;;  %v2200_v25 = vrot.slane %v2198_v17, 4  ;;  %v2203_v29 = vrot.slane %v2201_v10, 5  ;;  %v2211_v31 = vshrl.u32 %v6750_v59, 16 }
  0x56   : > { %v2196_v21 = vsel %vm6562_vm4, %v2191_v7, %v2195_v50  ;;  %v401_v39 = vrot.slane %v400_v11, 4  ;;  %v410_v42 = vor.u32 %v409_v13, %v405_v0  ;;  %v2209_v43 = vrot.slane %v2207_v18, 5  ;;  %v214_v50 = vld [vmem:[%s6536_s26 + $0x68] sm:$0x1] }
  0x57   : > { %v5262_v38 = vcombine.low %v2186_v6, %v2196_v21  ;;  %v2204_v44 = vor.u32 %v2203_v29, %v2200_v25  ;;  %v2213_v45 = vrot.slane %v2211_v31, 4  ;;  %v2217_v47 = vshll.u32 %v6757_v9, 16  ;;  %v6795_v29 = vld [vmem:[%s6536_s26 + $0x70] sm:$0xf] }
  0x58   : > { %v418_v26 = vshrl.u32 %v6761_v19, 16  ;;  %v406_v48 = vsel %vm6562_vm4, %v401_v39, %v405_v0  ;;  %v411_v49 = vrot.slane %v410_v42, 4  ;;  %v421_v51 = vshll.u32 %v6761_v19, 16  ;;  %v6782_v0 = vld [vmem:[%s6536_s26 + $0x6c] sm:$0xf] }
  0x59   : > { %5934 = vmatprep.mubr.msk.bf16.mxu0 %vm659_vm3, %v5262_v38  ;;  %v427_v52 = vshll.u32 %v6767_v35, 16  ;;  %v2205_v53 = vrot.slane %v2204_v44, 4  ;;  %v2214_v55 = vor.u32 %v2213_v45, %v2209_v43  ;;  %v2219_v56 = vrot.slane %v2217_v47, 5 }
  0x5a   : > { %v420_v57 = vrot.slane %v418_v26, 4  ;;  %v416_v61 = vsel %vm6562_vm4, %v411_v49, %v415_v14  ;;  %v423_v2 = vrot.slane %v421_v51, 5  ;;  %v431_v6 = vshrl.u32 %v6767_v35, 16  ;;  %v215_v26 = vld [vmem:[%s6536_s26 + $0x74] sm:$0x1] }
  0x5b   : > { %v429_v5 = vrot.slane %v427_v52, 5  ;;  %v5036_v7 = vcombine.low %v406_v48, %v416_v61  ;;  %v2210_v17 = vsel %vm6562_vm4, %v2205_v53, %v2209_v43  ;;  %v2215_v10 = vrot.slane %v2214_v55, 4  ;;  %v5289_v48 = vld [vmem:[%s6536_s26 + $0x18] sm:$0xe] }
  0x5c   : > { %v437_v11 = vshll.u32 %v214_v50, 16  ;;  %v424_v14 = vor.u32 %v423_v2, %v420_v57  ;;  %v433_v18 = vrot.slane %v431_v6, 4  ;;  %v5304_v21 = vrot.slane %v5288_v58, 9  ;;  %v6814_v53 = vld [vmem:[%s6536_s26 + $0x78] sm:$0xf] }
  0x5d   : > { %v2775_v25 = vrot.slane %v2773_v62, 4  ;;  %5799 = vmatmul.mubr.msk.bf16.gmra.mrb[12].mxu1 %vm659_vm3, %v5036_v7  ;;  %v2220_v31 = vsel %vm6562_vm4, %v2215_v10, %v2219_v56  ;;  %v442_v39 = vshrl.u32 %v6782_v0, 16  ;;  %v445_v42 = vshll.u32 %v6782_v0, 16  ;;  %v216_v57 = vld [vmem:[%s6536_s26 + $0x80] sm:$0x1] }
  0x5e   : > { %v439_v38 = vrot.slane %v437_v11, 5  ;;  %v5263_v43 = vcombine.low %v2210_v17, %v2220_v31  ;;  %v425_v44 = vrot.slane %v424_v14, 4  ;;  %v434_v45 = vor.u32 %v433_v18, %v429_v5  ;;  %v5290_v10 = vld [vmem:[%s6536_s26 + $0x24] sm:$0xe] }
  0x5f   : > { %v2774_v47 = vsel %vm6788_vm7, %v5304_v21, %v2773_v62  ;;  %v2777_v49 = vsel %vm6788_vm7, %v2775_v25, %v2776_v63  ;;  %v444_v50 = vrot.slane %v442_v39, 4  ;;  %v447_v51 = vrot.slane %v445_v42, 5  ;;  %v6840_v39 = vld [vmem:[%s6536_s26 + $0x84] sm:$0xf] }
  0x60   : > { %v451_v52 = vshll.u32 %v6795_v29, 16  ;;  %5935 = vmatmul.mubr.msk.bf16.gmra.mrb[12].mxu0 %vm659_vm3, %v5263_v43  ;;  %v430_v15 = vsel %vm6562_vm4, %v425_v44, %v429_v5  ;;  %v435_v62 = vrot.slane %v434_v45, 4  ;;  %v5321_v55 = vcombine.low %v2774_v47, %v2777_v49  ;;  %v6848_v43 = vld [vmem:[%s6536_s26 + $0x88] sm:$0xf] }
  0x61   : > { %v455_v56 = vshrl.u32 %v6795_v29, 16  ;;  %v448_v63 = vor.u32 %v447_v51, %v444_v50  ;;  %v461_v61 = vshll.u32 %v215_v26, 16  ;;  %v5305_v2 = vrot.slane %v5289_v48, 9 }
  0x62   : > { %v453_v58 = vrot.slane %v451_v52, 5  ;;  %v440_v6 = vsel %vm6562_vm4, %v435_v62, %v439_v38  ;;  %5956 = vmatprep.mubr.msk.bf16.mxu0 %vm659_vm3, %v5321_v55  ;;  %v2784_v5 = vsel %vm6788_vm7, %v6605_v30, %v2783_v28  ;;  %v466_v17 = vshrl.u32 %v6814_v53, 16  ;;  %v217_v52 = vld [vmem:[%s6536_s26 + $0x8c] sm:$0x1] }
  0x63   : > { %v457_v7 = vrot.slane %v455_v56, 4  ;;  %v5037_v11 = vcombine.low %v430_v15, %v440_v6  ;;  %v449_v14 = vrot.slane %v448_v63, 4  ;;  %v463_v18 = vrot.slane %v461_v61, 5 }
  0x64   : > { %v2781_v21 = vsel %vm6788_vm7, %v5305_v2, %v2780_v22  ;;  %v468_v38 = vrot.slane %v466_v17, 4  ;;  %v469_v1 = vshll.u32 %v6814_v53, 16  ;;  %v475_v30 = vshll.u32 %v6821_v16, 16  ;;  %v6853_v22 = vld [vmem:[%s8344_s1 + $0xe] sm:$0x3] }
  0x65   : > { %v458_v25 = vor.u32 %v457_v7, %v453_v58  ;;  %v5322_v31 = vcombine.low %v2781_v21, %v2784_v5  ;;  %5802 = vmatprep.mubr.msk.bf16.mxu1 %vm659_vm3, %v5037_v11  ;;  %v454_v28 = vsel %vm6562_vm4, %v449_v14, %v453_v58  ;;  %v479_v60 = vshrl.u32 %v6821_v16, 16  ;;  %v6872_v5 = vld [vmem:[%s6536_s26 + $0x90] sm:$0xf] }
  0x66   : > { %v485_v42 = vshll.u32 %v216_v57, 16  ;;  %v471_v45 = vrot.slane %v469_v1, 5  ;;  %v5306_v47 = vrot.slane %v5290_v10, 9  ;;  %v2787_v26 = vrot.slane %v6612_v46, 5  ;;  %v5291_v57 = vld [vmem:[%s6536_s26 + $0x30] sm:$0xe] }
  0x67   : > { %v459_v44 = vrot.slane %v458_v25, 4  ;;  %v477_v48 = vrot.slane %v475_v30, 5  ;;  %v481_v49 = vrot.slane %v479_v60, 4  ;;  %v2790_v51 = vrot.slane %v6621_v54, 5  ;;  %v6884_v30 = vld [vmem:[%s6536_s26 + $0x94] sm:$0xf] }
  0x68   : > { %v487_v50 = vrot.slane %v485_v42, 5  ;;  %5957 = vmatmul.mubr.msk.bf16.vlgmr.msra.gmra.mrb[0].mxu0 %vm659_vm3, %v5322_v31  ;;  %v472_v62 = vor.u32 %v471_v45, %v468_v38  ;;  %v2788_v55 = vsel %vm6788_vm7, %v5306_v47, %v2787_v26  ;;  %v2789_v56 = vrot.slane %v2787_v26, 4  ;;  %v218_v60 = vld [vmem:[%s6536_s26 + $0x98] sm:$0x1]  ;;  %v5292_v26 = vld [vmem:[%s6536_s26 + $0x3c] sm:$0xe] }
  0x69   : > { %v464_v15 = vsel %vm6562_vm4, %v459_v44, %v463_v18  ;;  %5989 = vmatpush3.bf16.msra.mxu0 %v6572_v41  ;;  %v482_v46 = vor.u32 %v481_v49, %v477_v48  ;;  %v490_v58 = vshrl.u32 %v6840_v39, 16  ;;  %v493_v54 = vshll.u32 %v6840_v39, 16 }
  0x6a   : > { %v5038_v63 = vcombine.low %v454_v28, %v464_v15  ;;  %v473_v61 = vrot.slane %v472_v62, 4  ;;  %v2791_v2 = vsel %vm6788_vm7, %v2789_v56, %v2790_v51  ;;  %v499_v6 = vshll.u32 %v6848_v43, 16  ;;  %6356 = vmatprep.subr.msk.bf16.mxu0 %vm708_vm0, %v6853_v22 }
  0x6b   : > { %v503_v7 = vshrl.u32 %v6848_v43, 16  ;;  %v483_v41 = vrot.slane %v482_v46, 4  ;;  %v5323_v17 = vcombine.low %v2788_v55, %v2791_v2  ;;  %v492_v10 = vrot.slane %v490_v58, 4  ;;  %v6904_v46 = vld [vmem:[%s6536_s26 + $0xa0] sm:$0xf] }
  0x6c   : > { %5803 = vmatmul.mubr.msk.bf16.gmra.mrb[16].mxu1 %vm659_vm3, %v5038_v63  ;;  %v495_v11 = vrot.slane %v493_v54, 5  ;;  %v478_v14 = vsel %vm6562_vm4, %v473_v61, %v477_v48  ;;  %v501_v18 = vrot.slane %v499_v6, 5  ;;  %v509_v25 = vshll.u32 %v217_v52, 16  ;;  %v6893_v52 = vld [vmem:[%s6536_s26 + $0x9c] sm:$0xf] }
  0x6d   : > { %v505_v21 = vrot.slane %v503_v7, 4  ;;  %v488_v31 = vsel %vm6562_vm4, %v483_v41, %v487_v50  ;;  %5960 = vmatprep.mubr.msk.bf16.mxu0 %vm659_vm3, %v5323_v17  ;;  %v5307_v1 = vrot.slane %v5291_v57, 9  ;;  %v2794_v28 = vrot.slane %v6641_v33, 5 }
  0x6e   : > { %v496_v38 = vor.u32 %v495_v11, %v492_v10  ;;  %v5039_v42 = vcombine.low %v478_v14, %v488_v31  ;;  %v511_v45 = vrot.slane %v509_v25, 5  ;;  %v2797_v47 = vrot.slane %v6649_v40, 5  ;;  %v219_v10 = vld [vmem:[%s6536_s26 + $0xa4] sm:$0x1]  ;;  %v5293_v11 = vld [vmem:[%s6536_s26 + $0x48] sm:$0xe] }
  0x6f   : > { %v506_v44 = vor.u32 %v505_v21, %v501_v18  ;;  %v2795_v49 = vsel %vm6788_vm7, %v5307_v1, %v2794_v28  ;;  %v2796_v50 = vrot.slane %v2794_v28, 4  ;;  %v514_v51 = vshrl.u32 %v6872_v5, 16 }
  0x70   : > { %v497_v48 = vrot.slane %v496_v38, 4  ;;  %5806 = vmatprep.mubr.msk.bf16.mxu1 %vm659_vm3, %v5039_v42  ;;  %v517_v15 = vshll.u32 %v6872_v5, 16  ;;  %v523_v62 = vshll.u32 %v6884_v30, 16  ;;  %v527_v40 = vshrl.u32 %v6884_v30, 16 }
  0x71   : > { %v507_v33 = vrot.slane %v506_v44, 4  ;;  %v2798_v56 = vsel %vm6788_vm7, %v2796_v50, %v2797_v47  ;;  %v516_v57 = vrot.slane %v514_v51, 4  ;;  %v533_v63 = vshll.u32 %v218_v60, 16 }
  0x72   : > { %v502_v55 = vsel %vm6562_vm4, %v497_v48, %v501_v18  ;;  %v5324_v54 = vcombine.low %v2795_v49, %v2798_v56  ;;  %v519_v61 = vrot.slane %v517_v15, 5  ;;  %v525_v2 = vrot.slane %v523_v62, 5  ;;  %v6930_v56 = vld [vmem:[%s6536_s26 + $0xac] sm:$0xf] }
  0x73   : > { %v512_v58 = vsel %vm6562_vm4, %v507_v33, %v511_v45  ;;  %v529_v7 = vrot.slane %v527_v40, 4  ;;  %v535_v41 = vrot.slane %v533_v63, 5  ;;  %v5308_v17 = vrot.slane %v5292_v26, 9  ;;  %v6925_v33 = vld [vmem:[%s6536_s26 + $0xa8] sm:$0xf] }
  0x74   : > { %v5040_v6 = vcombine.low %v502_v55, %v512_v58  ;;  %5961 = vmatmul.mubr.msk.bf16.gmra.mrb[4].mxu0 %vm659_vm3, %v5324_v54  ;;  %v520_v14 = vor.u32 %v519_v61, %v516_v57  ;;  %v2801_v18 = vrot.slane %v6666_v20, 5  ;;  %v2804_v21 = vrot.slane %v6671_v34, 5  ;;  %v220_v61 = vld [vmem:[%s6536_s26 + $0xb0] sm:$0x1] }
  0x75   : > { %v538_v25 = vshrl.u32 %v6893_v52, 16  ;;  %v530_v31 = vor.u32 %v529_v7, %v525_v2  ;;  %v541_v38 = vshll.u32 %v6893_v52, 16  ;;  %v547_v1 = vshll.u32 %v6904_v46, 16 }
  0x76   : > { %5807 = vmatmul.mubr.msk.bf16.gmra.mrb[20].mxu1 %vm659_vm3, %v5040_v6  ;;  %v551_v28 = vshrl.u32 %v6904_v46, 16  ;;  %v521_v60 = vrot.slane %v520_v14, 4  ;;  %v2802_v42 = vsel %vm6788_vm7, %v5308_v17, %v2801_v18  ;;  %v2803_v20 = vrot.slane %v2801_v18, 4  ;;  %v6945_v14 = vld [vmem:[%s6536_s26 + $0xb4] sm:$0xf] }
  0x77   : > { %v540_v44 = vrot.slane %v538_v25, 4  ;;  %v531_v34 = vrot.slane %v530_v31, 4  ;;  %v543_v45 = vrot.slane %v541_v38, 5  ;;  %v549_v47 = vrot.slane %v547_v1, 5 }
  0x78   : > { %v553_v26 = vrot.slane %v551_v28, 4  ;;  %v526_v48 = vsel %vm6562_vm4, %v521_v60, %v525_v2  ;;  %v2805_v49 = vsel %vm6788_vm7, %v2803_v20, %v2804_v21  ;;  %v557_v50 = vshll.u32 %v219_v10, 16  ;;  %v5294_v2 = vld [vmem:[%s6536_s26 + $0x54] sm:$0xe] }
  0x79   : > { %v5309_v51 = vrot.slane %v5293_v11, 9  ;;  %v536_v15 = vsel %vm6562_vm4, %v531_v34, %v535_v41  ;;  %v5325_v62 = vcombine.low %v2802_v42, %v2805_v49  ;;  %v544_v40 = vor.u32 %v543_v45, %v540_v44  ;;  %v6954_v42 = vld [vmem:[%s6536_s26 + $0xb8] sm:$0xf]  ;;  %v221_v49 = vld [vmem:[%s6536_s26 + $0xbc] sm:$0x1] }
  0x7a   : > { %v554_v55 = vor.u32 %v553_v26, %v549_v47  ;;  %v5041_v57 = vcombine.low %v526_v48, %v536_v15  ;;  %v559_v63 = vrot.slane %v557_v50, 5  ;;  %v2808_v58 = vrot.slane %v6689_v8, 5 }
  0x7b   : > { %v2811_v54 = vrot.slane %v6697_v23, 5  ;;  %5964 = vmatprep.mubr.msk.bf16.mxu0 %vm659_vm3, %v5325_v62  ;;  %v545_v6 = vrot.slane %v544_v40, 4  ;;  %v562_v41 = vshrl.u32 %v6925_v33, 16  ;;  %v565_v17 = vshll.u32 %v6925_v33, 16 }
  0x7c   : > { %v555_v7 = vrot.slane %v554_v55, 4  ;;  %5810 = vmatprep.mubr.msk.bf16.mxu1 %vm659_vm3, %v5041_v57  ;;  %v2809_v10 = vsel %vm6788_vm7, %v5309_v51, %v2808_v58  ;;  %v2810_v11 = vrot.slane %v2808_v58, 4  ;;  %v571_v8 = vshll.u32 %v6930_v56, 16  ;;  %v5295_v55 = vld [vmem:[%s6536_s26 + $0x60] sm:$0xe] }
  0x7d   : > { %v575_v23 = vshrl.u32 %v6930_v56, 16  ;;  %v550_v18 = vsel %vm6562_vm4, %v545_v6, %v549_v47  ;;  %v564_v25 = vrot.slane %v562_v41, 4  ;;  %v567_v31 = vrot.slane %v565_v17, 5  ;;  %v5296_v6 = vld [vmem:[%s6536_s26 + $0x6c] sm:$0xe] }
  0x7e   : > { %v560_v21 = vsel %vm6562_vm4, %v555_v7, %v559_v63  ;;  %v2812_v1 = vsel %vm6788_vm7, %v2810_v11, %v2811_v54  ;;  %v573_v28 = vrot.slane %v571_v8, 5  ;;  %v581_v34 = vshll.u32 %v220_v61, 16  ;;  %v5232_v11 = vld [vmem:[%s6536_s26 + $0x70] sm:$0xf]  ;;  %v5233_v8 = vld [vmem:[%s6536_s26 + $0x74] sm:$0x1] }
  0x7f   : > { %v5042_v38 = vcombine.low %v550_v18, %v560_v21  ;;  %v577_v60 = vrot.slane %v575_v23, 4  ;;  %v5326_v20 = vcombine.low %v2809_v10, %v2812_v1  ;;  %v568_v44 = vor.u32 %v567_v31, %v564_v25 }
  0x80   : > { %v5310_v45 = vrot.slane %v5294_v2, 9  ;;  %v2815_v26 = vrot.slane %v6720_v4, 5  ;;  %v2818_v48 = vrot.slane %v6726_v12, 5  ;;  %v586_v50 = vshrl.u32 %v6945_v14, 16 }
  0x81   : > { %5811 = vmatmul.mubr.msk.bf16.gmra.mrb[24].mxu1 %vm659_vm3, %v5042_v38  ;;  %v578_v47 = vor.u32 %v577_v60, %v573_v28  ;;  %5965 = vmatmul.mubr.msk.bf16.gmra.mrb[8].mxu0 %vm659_vm3, %v5326_v20  ;;  %v569_v51 = vrot.slane %v568_v44, 4  ;;  %v583_v15 = vrot.slane %v581_v34, 5  ;;  %v589_v62 = vshll.u32 %v6945_v14, 16 }
  0x82   : > { %v595_v40 = vshll.u32 %v6954_v42, 16  ;;  %v2816_v4 = vsel %vm6788_vm7, %v5310_v45, %v2815_v26  ;;  %v2817_v12 = vrot.slane %v2815_v26, 4  ;;  %v588_v63 = vrot.slane %v586_v50, 4 }
  0x83   : > { %v579_v57 = vrot.slane %v578_v47, 4  ;;  %v574_v58 = vsel %vm6562_vm4, %v569_v51, %v573_v28  ;;  %v591_v54 = vrot.slane %v589_v62, 5  ;;  %v599_v2 = vshrl.u32 %v6954_v42, 16  ;;  %v5297_v47 = vld [vmem:[%s6536_s26 + $0x78] sm:$0xe] }
  0x84   : > { %v597_v61 = vrot.slane %v595_v40, 5  ;;  %v2819_v41 = vsel %vm6788_vm7, %v2817_v12, %v2818_v48  ;;  %v605_v17 = vshll.u32 %v221_v49, 16  ;;  %v5311_v10 = vrot.slane %v5295_v55, 9  ;;  %v6415_v51 = vld [vmem:[%s6536_s26] sm:$0xf] }
  0x85   : > { %v584_v7 = vsel %vm6562_vm4, %v579_v57, %v583_v15  ;;  %v5327_v18 = vcombine.low %v2816_v4, %v2819_v41  ;;  %v592_v21 = vor.u32 %v591_v54, %v588_v63  ;;  %v601_v25 = vrot.slane %v599_v2, 4  ;;  %v6992_v15 = vld [vmem:[%s6536_s26 + $0x4] sm:$0xf]  ;;  %v6996_v40 = vld [vmem:[%s6536_s26 + $0x7c] sm:$0xf] }
  0x86   : > { %v5043_v23 = vcombine.low %v574_v58, %v584_v7  ;;  %v607_v31 = vrot.slane %v605_v17, 5  ;;  %v2822_v38 = vrot.slane %v6750_v59, 5  ;;  %v2825_v1 = vrot.slane %v6757_v9, 5  ;;  %v6999_v55 = vld [vmem:[%s6536_s26 + $0x80] sm:$0x1] }
  0x87   : > { %v5312_v28 = vrot.slane %v5296_v6, 9  ;;  %5968 = vmatprep.mubr.msk.bf16.mxu0 %vm659_vm3, %v5327_v18  ;;  %v593_v60 = vrot.slane %v592_v21, 4  ;;  %v602_v20 = vor.u32 %v601_v25, %v597_v61  ;;  %v2829_v44 = vrot.slane %v5232_v11, 5  ;;  %v5238_v57 = vld [vmem:[%s6536_s26 + $0x88] sm:$0xf] }
  0x88   : > { %5814 = vmatprep.mubr.msk.bf16.mxu1 %vm659_vm3, %v5043_v23  ;;  %v2832_v34 = vrot.slane %v5233_v8, 5  ;;  %v2823_v45 = vsel %vm6788_vm7, %v5311_v10, %v2822_v38  ;;  %v2824_v59 = vrot.slane %v2822_v38, 4  ;;  %v5061_v62 = vcombine.low %v6415_v51, %v6992_v15  ;;  %v5239_v54 = vld [vmem:[%s6536_s26 + $0x8c] sm:$0x1]  ;;  %v5241_v17 = vld [vmem:[%s6536_s26 + $0x94] sm:$0xf] }
  0x89   : > { %v598_v9 = vsel %vm6562_vm4, %v593_v60, %v597_v61  ;;  %v603_v26 = vrot.slane %v602_v20, 4  ;;  %v2830_v48 = vsel %vm6788_vm7, %v5312_v28, %v2829_v44  ;;  %v2831_v49 = vrot.slane %v2829_v44, 4  ;;  %v5298_v61 = vld [vmem:[%s6536_s26 + $0x84] sm:$0xe]  ;;  %v5299_v23 = vld [vmem:[%s6536_s26 + $0x90] sm:$0xe] }
  0x8a   : > { %v2826_v50 = vsel %vm6788_vm7, %v2824_v59, %v2825_v1  ;;  %v5313_v58 = vrot.slane %v5297_v47, 9  ;;  %v2836_v7 = vrot.slane %v6996_v40, 5  ;;  %v2839_v41 = vrot.slane %v6999_v55, 5  ;;  %v5242_v25 = vld [vmem:[%s6536_s26 + $0x98] sm:$0x1] }
  0x8b   : > { %v608_v4 = vsel %vm6562_vm4, %v603_v26, %v607_v31  ;;  %v5328_v12 = vcombine.low %v2823_v45, %v2826_v50  ;;  %v2833_v63 = vsel %vm6788_vm7, %v2831_v49, %v2832_v34  ;;  %v5314_v10 = vrot.slane %v5298_v61, 9  ;;  %v5244_v31 = vld [vmem:[%s6536_s26 + $0xa0] sm:$0xf]  ;;  %v5245_v60 = vld [vmem:[%s6536_s26 + $0xa4] sm:$0x1] }
  0x8c   : > { %v5044_v2 = vcombine.low %v598_v9, %v608_v4  ;;  %v5329_v6 = vcombine.low %v2830_v48, %v2833_v63  ;;  %v2843_v11 = vrot.slane %v5238_v57, 5  ;;  %v2846_v8 = vrot.slane %v5239_v54, 5  ;;  %v5300_v20 = vld [vmem:[%s6536_s26 + $0x9c] sm:$0xe]  ;;  %v6417_v44 = vld [vmem:[%s6536_s26 + $0xc] sm:$0xf] }
  0x8d   : > { %5969 = vmatmul.mubr.msk.bf16.gmra.mrb[12].mxu0 %vm659_vm3, %v5328_v12  ;;  %v2837_v18 = vsel %vm6788_vm7, %v5313_v58, %v2836_v7  ;;  %v2838_v21 = vrot.slane %v2836_v7, 4  ;;  %v2850_v28 = vrot.slane %v5241_v17, 5  ;;  %v7026_v34 = vld [vmem:[%s6536_s26 + $0x10] sm:$0xf]  ;;  %v6419_v47 = vld [vmem:[%s6536_s26 + $0x18] sm:$0xf] }
  0x8e   : > { %5815 = vmatmul.mubr.msk.bf16.gmra.mrb[28].mxu1 %vm659_vm3, %v5044_v2  ;;  %5972 = vmatprep.mubr.msk.bf16.mxu0 %vm659_vm3, %v5329_v6  ;;  %v2844_v38 = vsel %vm6788_vm7, %v5314_v10, %v2843_v11  ;;  %v2845_v1 = vrot.slane %v2843_v11, 4  ;;  %v5062_v45 = vcombine.low %v6417_v44, %v7026_v34  ;;  %v7033_v9 = vld [vmem:[%s6536_s26 + $0x1c] sm:$0xf]  ;;  %v5315_v48 = vrot.slane %v5299_v23, 9  ;;  %v5247_v57 = vld [vmem:[%s6536_s26 + $0xac] sm:$0xf] }
  0x8f   : > { %5820 = vmatprep.mubr.msk.bf16.mxu1 %vm659_vm3, %v5061_v62  ;;  %v2840_v59 = vsel %vm6788_vm7, %v2838_v21, %v2839_v41  ;;  %v5063_v26 = vcombine.low %v6419_v47, %v7033_v9  ;;  %v2852_v51 = vrot.slane %v2850_v28, 4  ;;  %v2853_v62 = vrot.slane %v5242_v25, 5  ;;  %v6421_v54 = vld [vmem:[%s8344_s1 + $0x4] sm:$0x3]  ;;  %v5250_v2 = vld [vmem:[%s6536_s26 + $0xb8] sm:$0xf] }
  0x90   : > { %v5330_v49 = vcombine.low %v2837_v18, %v2840_v59  ;;  %v2847_v50 = vsel %vm6788_vm7, %v2845_v1, %v2846_v8  ;;  %v5316_v12 = vrot.slane %v5300_v20, 9  ;;  %v2857_v63 = vrot.slane %v5244_v31, 5  ;;  %v7048_v7 = vld [vmem:[%s8344_s1 + $0x6] sm:$0x3]  ;;  %v5248_v10 = vld [vmem:[%s6536_s26 + $0xb0] sm:$0x1] }
  0x91   : > { %v5331_v4 = vcombine.low %v2844_v38, %v2847_v50  ;;  %v2860_v58 = vrot.slane %v5245_v60, 5  ;;  %v1427_v61 = vsel %vm708_vm0, %v6421_v54, 0  ;;  %v2851_v41 = vsel %vm6788_vm7, %v5315_v48, %v2850_v28  ;;  %v5301_v11 = vld [vmem:[%s6536_s26 + $0xa8] sm:$0xe]  ;;  %v5251_v25 = vld [vmem:[%s6536_s26 + $0xbc] sm:$0x1] }
  0x92   : > { %v2859_v6 = vrot.slane %v2857_v63, 4  ;;  %v2854_v17 = vsel %vm6788_vm7, %v2852_v51, %v2853_v62  ;;  %v2864_v8 = vrot.slane %v5247_v57, 5  ;;  %v2858_v23 = vsel %vm6788_vm7, %v5316_v12, %v2857_v63  ;;  %v5302_v31 = vld [vmem:[%s6536_s26 + $0xb4] sm:$0xe]  ;;  %v6422_v38 = vld [vmem:[%s6536_s26 + $0x24] sm:$0xf] }
  0x93   : > { %v2871_v21 = vrot.slane %v5250_v2, 5  ;;  %v7069_v1 = vld [vmem:[%s6536_s26 + $0x28] sm:$0xf]  ;;  %v5332_v60 = vcombine.low %v2851_v41, %v2854_v17  ;;  %v5317_v44 = vrot.slane %v5301_v11, 9  ;;  %v2867_v59 = vrot.slane %v5248_v10, 5 }
  0x94   : > { %v2861_v18 = vsel %vm6788_vm7, %v2859_v6, %v2860_v58  ;;  %v5064_v28 = vcombine.low %v6422_v38, %v7069_v1  ;;  %v6424_v47 = vld [vmem:[%s6536_s26 + $0x30] sm:$0xf]  ;;  %v2874_v51 = vrot.slane %v5251_v25, 5  ;;  %v5253_v62 = vld [vmem:[%s6536_s26 + $0xc4] sm:$0xf]  ;;  %v2259_v25 = vshrl.u32 %v6996_v40, 16 }
  0x95   : > { %5973 = vmatmul.mubr.msk.bf16.gmra.mrb[16].mxu0 %vm659_vm3, %v5330_v49  ;;  %v5333_v20 = vcombine.low %v2858_v23, %v2861_v18  ;;  %v5318_v49 = vrot.slane %v5302_v31, 9  ;;  %v2873_v50 = vrot.slane %v2871_v21, 4  ;;  %v2865_v57 = vsel %vm6788_vm7, %v5317_v44, %v2864_v8  ;;  %v5303_v12 = vld [vmem:[%s6536_s26 + $0xc0] sm:$0xe]  ;;  %v6426_v41 = vld [vmem:[%s6536_s26 + $0x3c] sm:$0xf] }
  0x96   : > { %5821 = vmatmul.mubr.msk.bf16.vlgmr.msra.gmra.mrb[0].mxu1 %vm659_vm3, %v5062_v45  ;;  %5976 = vmatprep.mubr.msk.bf16.mxu0 %vm659_vm3, %v5331_v4  ;;  %v2866_v45 = vrot.slane %v2864_v8, 4  ;;  %v2878_v63 = vrot.slane %v5253_v62, 5  ;;  %v5319_v6 = vrot.slane %v5303_v12, 9  ;;  %v7094_v17 = vld [vmem:[%s6536_s26 + $0x40] sm:$0xf]  ;;  %v5067_v18 = vcombine.low %v6701_v27, %v6704_v36  ;;  %v6378_v62 = vld [vmem:[%s6536_s26 + $0x24] sm:$0xff]  }
  0x97   : > { %5853 = vmatpush3.bf16.msra.mxu1 %v1427_v61  ;;  %5824 = vmatprep.mubr.msk.bf16.mxu1 %vm659_vm3, %v5063_v26  ;;  %v7074_v26 = vld [vmem:[%s6536_s26 + $0x34] sm:$0xf]  ;;  %v2872_v58 = vsel %vm6788_vm7, %v5318_v49, %v2871_v21  ;;  %v2875_v54 = vsel %vm6788_vm7, %v2873_v50, %v2874_v51  ;;  %v5254_v61 = vld [vmem:[%s6536_s26 + $0xc8] sm:$0x1]  ;;  %v5066_v10 = vcombine.low %v6426_v41, %v7094_v17  ;;  %v2255_v21 = vshll.u32 %v6996_v40, 16 }
  0x98   : > { %6351 = vmatprep.subr.msk.bf16.mxu1 %vm708_vm0, %v7048_v7  ;;  %v5065_v48 = vcombine.low %v6424_v47, %v7074_v26  ;;  %v2868_v4 = vsel %vm6788_vm7, %v2866_v45, %v2867_v59  ;;  %v5335_v11 = vcombine.low %v2872_v58, %v2875_v54  ;;  %v2880_v8 = vrot.slane %v2878_v63, 4  ;;  %v1165_v45 = vld [vmem:[%s6536_s26] sm:$0xe]  ;;  %v1166_v59 = vld [vmem:[%s6536_s26 + $0xc] sm:$0xe] }
  0x99   : > { %v5334_v2 = vcombine.low %v2865_v57, %v2868_v4  ;;  %v2881_v23 = vrot.slane %v5254_v61, 5  ;;  %v2879_v31 = vsel %vm6788_vm7, %v5319_v6, %v2878_v63  ;;  %v7109_v27 = vrot.slane %v2255_v21, 5  ;;  %v1169_v41 = vld [vmem:[%s6536_s26 + $0x30] sm:$0xe] }
  0x9a   : > { %v2261_v36 = vrot.slane %v2259_v25, 4  ;;  %v5069_v44 = vcombine.low %v6761_v19, %v6767_v35  ;;  %v2265_v47 = vshll.u32 %v6999_v55, 16  ;;  %v5093_v19 = vrot.slane %v1165_v45, 9 }
  0x9b   : > { %v2882_v38 = vsel %vm6788_vm7, %v2880_v8, %v2881_v23  ;;  %8365 = vst [vmem:[#allocation3_spill] sm:$0xff] %v7109_v27  ;;  %v5094_v35 = vrot.slane %v1166_v59, 9  ;;  %v1232_v4 = vrot.slane %v7033_v9, 5  ;;  %v1239_v12 = vrot.slane %v7069_v1, 5  ;;  %v1170_v8 = vld [vmem:[%s6536_s26 + $0x3c] sm:$0xe] }
  0x9c   : > { %v5336_v40 = vcombine.low %v2879_v31, %v2882_v38  ;;  %v2262_v49 = vor.u32 %v2261_v36, %v7109_v27  ;;  %v7129_v51 = vrot.slane %v2265_v47, 5  ;;  %v5070_v58 = vcombine.low %v6782_v0, %v6795_v29  ;;  %v1171_v31 = vld [vmem:[%s6536_s26 + $0x48] sm:$0xe]  ;;  %v6432_v59 = vld [vmem:[%s6536_s26 + $0x38] sm:$0x1] }
  0x9d   : > { %5977 = vmatmul.mubr.msk.bf16.gmra.mrb[20].mxu0 %vm659_vm3, %v5332_v60  ;;  %v5068_v60 = vcombine.low %v6730_v24, %v6736_v37  ;;  %v6429_v24 = vld [vmem:[%s6536_s26 + $0x14] sm:$0x1]  ;;  %v4067_v54 = vsel %vm708_vm0, %v6853_v22, 0  ;;  %v5071_v61 = vcombine.low %v6814_v53, %v6821_v16  ;;  %v5072_v6 = vcombine.low %v6840_v39, %v6848_v43  ;;  %v6430_v16 = vld [vmem:[%s6536_s26 + $0x20] sm:$0x1] }
  0x9e   : > { %5825 = vmatmul.mubr.msk.bf16.gmra.mrb[4].mxu1 %vm659_vm3, %v5064_v28  ;;  %5980 = vmatprep.mubr.msk.bf16.mxu0 %vm659_vm3, %v5333_v20  ;;  %v1225_v28 = vrot.slane %v7026_v34, 5  ;;  %v6376_v20 = vld [vmem:[%s6536_s26 + $0x18] sm:$0xff]   ;;  %v6428_v34 = vld [vmem:[%s6536_s26 + $0x8] sm:$0x1]  ;;  %v1228_v37 = vrot.slane %v6429_v24, 5  ;;  %8366 = vst [vmem:[#allocation4_spill] sm:$0xff] %v7129_v51  ;;  %v5073_v9 = vcombine.low %v6872_v5, %v6884_v30 }
  0x9f   : > { %5828 = vmatprep.mubr.msk.bf16.mxu1 %vm659_vm3, %v5065_v48  ;;  %v1218_v48 = vrot.slane %v6992_v15, 5  ;;  %v1221_v50 = vrot.slane %v6428_v34, 5  ;;  %v1167_v15 = vld [vmem:[%s6536_s26 + $0x18] sm:$0xe]  ;;  %v7134_v63 = vrot.slane %v2262_v49, 4  ;;  %v1235_v22 = vrot.slane %v6430_v16, 5 }
  0xa0   : > { %v1227_v55 = vrot.slane %v1225_v28, 4  ;;  %v5095_v1 = vrot.slane %v1167_v15, 9  ;;  %v7156_v29 = vsel %vm6788_vm7, %v5094_v35, %v1225_v28  ;;  %v1241_v25 = vrot.slane %v1239_v12, 4  ;;  %v5418_v24 = vld [vmem:[%s6536_s26 + $0x18] sm:$0xf] }
  0xa1   : > { %v1220_v57 = vrot.slane %v1218_v48, 4  ;;  %8367 = vst [vmem:[#allocation5_spill] sm:$0xff] %v7134_v63  ;;  %v7152_v0 = vsel %vm6788_vm7, %v5093_v19, %v1218_v48  ;;  %v1249_v47 = vrot.slane %v6432_v59, 5  ;;  %v7193_v49 = vsel %vm708_vm0, %v7048_v7, 0  ;;  %v5419_v7 = vld [vmem:[%s6536_s26 + $0x1c] sm:$0xf] }
  0xa2   : > { %v7160_v53 = vsel %vm6788_vm7, %v1227_v55, %v1228_v37  ;;  %v7197_v34 = vsel %vm6788_vm7, %v5095_v1, %v1232_v4  ;;  %v6382_v37 = vld [vmem:[%s6536_s26 + $0x3c] sm:$0xff]   ;;  %v5098_v35 = vrot.slane %v1170_v8, 9  ;;  %v6433_v55 = vld [vmem:[%s6536_s26 + $0x44] sm:$0x1]  ;;  %v3588_v8 = vshll.u32 %v5418_v24, 16 }
  0xa3   : > { %v7171_v23 = vsel %vm6788_vm7, %v1220_v57, %v1221_v50  ;;  %v1172_v50 = vld [vmem:[%s6536_s26 + $0x54] sm:$0xe]  ;;  %v1256_v15 = vrot.slane %v6433_v55, 5  ;;  %v5422_v39 = vld [vmem:[%s6536_s26 + $0x28] sm:$0xf] }
  0xa4   : > { %v6440_v5 = vld [vmem:[%s6536_s26 + $0x70] sm:$0xf] }
  0xa5   : > { %5981 = vmatmul.mubr.msk.bf16.gmra.mrb[24].mxu0 %vm659_vm3, %v5334_v2  ;;  %v1168_v2 = vld [vmem:[%s6536_s26 + $0x24] sm:$0xe]  ;;  %v1281_v30 = vrot.slane %v6440_v5, 5 }
  0xa6   : > { %5829 = vmatmul.mubr.msk.bf16.gmra.mrb[8].mxu1 %vm659_vm3, %v5066_v10  ;;  %5984 = vmatprep.mubr.msk.bf16.mxu0 %vm659_vm3, %v5335_v11  ;;  %v1246_v10 = vrot.slane %v7074_v26, 5  ;;  %v6380_v11 = vld [vmem:[%s6536_s26 + $0x30] sm:$0xff]   ;;  %v5096_v21 = vrot.slane %v1168_v2, 9 }
  0xa7   : > { %5832 = vmatprep.mubr.msk.bf16.mxu1 %vm659_vm3, %v5067_v18  ;;  %v7167_v26 = vld [vmem:[%s8344_s1 + $0x10] sm:$0x3]  ;;  %v1234_v18 = vrot.slane %v1232_v4, 4  ;;  %v1283_v48 = vrot.slane %v1281_v30, 4 }
  0xa8   : > { %v1248_v45 = vrot.slane %v1246_v10, 4  ;;  %v7204_v19 = vsel %vm6788_vm7, %v5096_v21, %v1239_v12  ;;  %v3598_v21 = vshrl.u32 %v5419_v7, 16 }
  0xa9   : > { %v7213_v4 = vsel %vm6788_vm7, %v1234_v18, %v1235_v22  ;;  %v3585_v22 = vshrl.u32 %v5418_v24, 16  ;;  %v3594_v18 = vshll.u32 %v5419_v7, 16  ;;  %v5421_v24 = vld [vmem:[%s6536_s26 + $0x24] sm:$0xf] }
  0xaa   : > { %v7226_v1 = vsel %vm6788_vm7, %v1248_v45, %v1249_v47 }
  0xab   : > { %v3587_v43 = vrot.slane %v3585_v22, 4  ;;  %v7268_v7 = vrot.slane %v3594_v18, 5  ;;  %v3612_v22 = vshll.u32 %v5421_v24, 16  ;;  %v3622_v18 = vshrl.u32 %v5422_v39, 16 }
  0xad   : > { %5985 = vmatmul.mubr.msk.bf16.gmra.mrb[28].mxu0 %vm659_vm3, %v5336_v40  ;;  %v6431_v40 = vld [vmem:[%s6536_s26 + $0x2c] sm:$0x1]  ;;  %v3614_v27 = vrot.slane %v3612_v22, 5 }
  0xae   : > { %5833 = vmatmul.mubr.msk.bf16.gmra.mrb[12].mxu1 %vm659_vm3, %v5068_v60  ;;  %5990 = vmatprep.mubr.msk.bf16.mxu0 %vm659_vm3, %v6376_v20  ;;  %v1242_v28 = vrot.slane %v6431_v40, 5  ;;  %v1253_v60 = vrot.slane %v7094_v17, 5  ;;  %v6436_v40 = vld [vmem:[%s6536_s26 + $0x50] sm:$0x1]  ;;  %v6441_v17 = vld [vmem:[%s6536_s26 + $0x74] sm:$0x1] }
  0xaf   : > { %5836 = vmatprep.mubr.msk.bf16.mxu1 %vm659_vm3, %v5069_v44  ;;  %v5097_v44 = vrot.slane %v1169_v41, 9  ;;  %v5100_v41 = vrot.slane %v1172_v50, 9  ;;  %v1173_v50 = vld [vmem:[%s6536_s26 + $0x60] sm:$0xe]  ;;  %v5423_v20 = vld [vmem:[%s6536_s26 + $0x2c] sm:$0x1] }
  0xb0   : > { %v1255_v12 = vrot.slane %v1253_v60, 4  ;;  %v7239_v45 = vsel %vm6788_vm7, %v5098_v35, %v1253_v60  ;;  %v6437_v35 = vld [vmem:[%s6536_s26 + $0x5c] sm:$0x1] }
  0xb1   : > { %v7222_v2 = vsel %vm6788_vm7, %v5097_v44, %v1246_v10  ;;  %v1270_v55 = vrot.slane %v6437_v35, 5  ;;  %v1174_v35 = vld [vmem:[%s6536_s26 + $0x6c] sm:$0xe] }
  0xb2   : > { %v7243_v59 = vsel %vm6788_vm7, %v1255_v12, %v1256_v15  ;;  %v6438_v15 = vld [vmem:[%s6536_s26 + $0x64] sm:$0xf]  ;;  %v3600_v12 = vrot.slane %v3598_v21, 4  ;;  %v5102_v5 = vrot.slane %v1174_v35, 9 }
  0xb3   : > { %v6388_v21 = vld [vmem:[%s6536_s26 + $0x60] sm:$0xff]  }
  0xb5   : > { %5991 = vmatmul.mubr.msk.bf16.vlgmr.msra.gmra.mrb[0].mxu0 %vm659_vm3, %v6378_v62  ;;  %v6434_v62 = vld [vmem:[%s6536_s26 + $0x4c] sm:$0xf] }
  0xb6   : > { %5837 = vmatmul.mubr.msk.bf16.gmra.mrb[16].mxu1 %vm659_vm3, %v5070_v58  ;;  %6023 = vmatpush3.bf16.msra.mxu0 %v4067_v54  ;;  %v1260_v57 = vrot.slane %v6434_v62, 5  ;;  %v7217_v58 = vsel %vm6788_vm7, %v1241_v25, %v1242_v28  ;;  %v5099_v54 = vrot.slane %v1171_v31, 9  ;;  %v1263_v28 = vrot.slane %v6436_v40, 5 }
  0xb7   : > { %5840 = vmatprep.mubr.msk.bf16.mxu1 %vm659_vm3, %v5071_v61  ;;  %5994 = vmatprep.mubr.msk.bf16.mxu0 %vm659_vm3, %v6380_v11  ;;  %v6384_v61 = vld [vmem:[%s6536_s26 + $0x48] sm:$0xff]   ;;  %v6435_v11 = vld [vmem:[%s6536_s26 + $0x58] sm:$0xf]  ;;  %v1274_v62 = vrot.slane %v6438_v15, 5  ;;  %v5425_v15 = vld [vmem:[%s6536_s26 + $0x34] sm:$0xf] }
  0xb8   : > { %6357 = vmatprep.subr.msk.bf16.mxu0 %vm708_vm0, %v7167_v26  ;;  %v1267_v16 = vrot.slane %v6435_v11, 5  ;;  %v1262_v31 = vrot.slane %v1260_v57, 4  ;;  %v7247_v47 = vsel %vm6788_vm7, %v5099_v54, %v1260_v57  ;;  %v5420_v57 = vld [vmem:[%s6536_s26 + $0x20] sm:$0x1]  ;;  %v5424_v54 = vld [vmem:[%s6536_s26 + $0x30] sm:$0xf] }
  0xb9   : > { %v5101_v11 = vrot.slane %v1173_v50, 9  ;;  %v3636_v50 = vshll.u32 %v5424_v54, 16  ;;  %v3604_v25 = vshll.u32 %v5420_v57, 16  ;;  %v3642_v36 = vshll.u32 %v5425_v15, 16 }
  0xba   : > { %v7258_v60 = vsel %vm6788_vm7, %v5100_v41, %v1267_v16  ;;  %v7274_v41 = vsel %vm6788_vm7, %v1262_v31, %v1263_v28  ;;  %v1276_v31 = vrot.slane %v1274_v62, 4  ;;  %v3633_v28 = vshrl.u32 %v5424_v54, 16 }
  0xbb   : > { %v7316_v35 = vrot.slane %v3642_v36, 5 }
  0xbd   : > { %5995 = vmatmul.mubr.msk.bf16.gmra.mrb[4].mxu0 %vm659_vm3, %v6382_v37  ;;  %v1269_v37 = vrot.slane %v1267_v16, 4  ;;  %v6439_v16 = vld [vmem:[%s6536_s26 + $0x68] sm:$0x1] }
  0xbe   : > { %5841 = vmatmul.mubr.msk.bf16.gmra.mrb[20].mxu1 %vm659_vm3, %v5072_v6  ;;  %5998 = vmatprep.mubr.msk.bf16.mxu0 %vm659_vm3, %v6384_v61  ;;  %v3590_v6 = vrot.slane %v3588_v8, 5  ;;  %v6386_v61 = vld [vmem:[%s6536_s26 + $0x54] sm:$0xff]   ;;  %v1277_v40 = vrot.slane %v6439_v16, 5  ;;  %v3618_v8 = vshll.u32 %v5422_v39, 16  ;;  %v3601_v16 = vor.u32 %v3600_v12, %v7268_v7 }
  0xbf   : > { %5844 = vmatprep.mubr.msk.bf16.mxu1 %vm659_vm3, %v5073_v9  ;;  %v3609_v9 = vshrl.u32 %v5421_v24, 16  ;;  %v7283_v44 = vsel %vm6788_vm7, %v1269_v37, %v1270_v55  ;;  %v1284_v24 = vrot.slane %v6441_v17, 5  ;;  %v3646_v39 = vshrl.u32 %v5425_v15, 16 }
  0xc0   : > { %v3591_v10 = vor.u32 %v3590_v6, %v3587_v43  ;;  %v7289_v37 = vrot.slane %v3618_v8, 5  ;;  %v3624_v55 = vrot.slane %v3622_v18, 4  ;;  %v8368_v43 = vcombine.low %v6893_v52, %v6904_v46  ;;  %v6442_v8 = vld [vmem:[%s6536_s26 + $0x7c] sm:$0xf]  ;;  %v7325_v18 = vld [vmem:[%s6536_s26 + $0x38] sm:$0x1] }
  0xc1   : > { %v3611_v38 = vrot.slane %v3609_v9, 4  ;;  %v7298_v17 = vsel %vm6788_vm7, %v5101_v11, %v1274_v62  ;;  %v7302_v57 = vsel %vm6788_vm7, %v1276_v31, %v1277_v40  ;;  %v3635_v6 = vrot.slane %v3633_v28, 4  ;;  %8370 = vst [vmem:[#allocation6_spill] sm:$0xff] %v7325_v18 }
  0xc2   : > { %v3638_v12 = vrot.slane %v3636_v50, 5  ;;  %v8369_v52 = vcombine.low %v6925_v33, %v6930_v56  ;;  %v3592_v46 = vrot.slane %v3591_v10, 4  ;;  %v3602_v54 = vrot.slane %v3601_v16, 4  ;;  %v6390_v33 = vld [vmem:[%s6536_s26 + $0x6c] sm:$0xff]   ;;  %v1176_v16 = vld [vmem:[%s6536_s26 + $0x84] sm:$0xe] }
  0xc3   : > { %v3628_v62 = vshll.u32 %v5423_v20, 16  ;;  %v7310_v11 = vsel %vm6788_vm7, %v5102_v5, %v1281_v30  ;;  %v7314_v40 = vsel %vm6788_vm7, %v1283_v48, %v1284_v24  ;;  %v3648_v9 = vrot.slane %v3646_v39, 4  ;;  %v6391_v48 = vld [vmem:[%s6536_s26 + $0x78] sm:$0xff]  }
  0xc4   : > { %v3615_v10 = vor.u32 %v3614_v27, %v3611_v38  ;;  %v3625_v20 = vor.u32 %v3624_v55, %v7289_v37  ;;  %v1288_v30 = vrot.slane %v6442_v8, 5  ;;  %v3639_v38 = vor.u32 %v3638_v12, %v3635_v6  ;;  %v5427_v5 = vld [vmem:[%s6536_s26 + $0x3c] sm:$0xf] }
  0xc5   : > { %5999 = vmatmul.mubr.msk.bf16.gmra.mrb[8].mxu0 %vm659_vm3, %v6386_v61  ;;  %v3606_v61 = vrot.slane %v3604_v25, 5  ;;  %v1175_v25 = vld [vmem:[%s6536_s26 + $0x78] sm:$0xe]  ;;  %v7341_v50 = vrot.slane %v3628_v62, 5  ;;  %v3649_v39 = vor.u32 %v3648_v9, %v7316_v35  ;;  %v3652_v55 = vshll.u32 %v7325_v18, 16 }
  0xc6   : > { %5845 = vmatmul.mubr.msk.bf16.gmra.mrb[24].mxu1 %vm659_vm3, %v8368_v43  ;;  %6002 = vmatprep.mubr.msk.bf16.mxu0 %vm659_vm3, %v6388_v21  ;;  %v3597_v21 = vsel %vm6562_vm4, %v3592_v46, %v7268_v7  ;;  %v5103_v24 = vrot.slane %v1175_v25, 9  ;;  %v6443_v43 = vld [vmem:[%s6536_s26 + $0x88] sm:$0xf]  ;;  %v7349_v7 = vld [vmem:[%s6536_s26 + $0x40] sm:$0xf]  ;;  %v3616_v12 = vrot.slane %v3615_v10, 4  ;;  %v8372_v62 = vcombine.low %v6945_v14, %v6954_v42 }
  0xc7   : > { %5848 = vmatprep.mubr.msk.bf16.mxu1 %vm659_vm3, %v8369_v52  ;;  %v3607_v31 = vsel %vm6562_vm4, %v3602_v54, %v3606_v61  ;;  %v1295_v6 = vrot.slane %v6443_v43, 5  ;;  %8371 = vst [vmem:[#allocation7_spill] sm:$0xff] %v7349_v7  ;;  %v3626_v52 = vrot.slane %v3625_v20, 4  ;;  %v1290_v46 = vrot.slane %v1288_v30, 4  ;;  %v6444_v54 = vld [vmem:[%s6536_s26 + $0x80] sm:$0x1] }
  0xc8   : > { %v1291_v61 = vrot.slane %v6444_v54, 5  ;;  %v3640_v9 = vrot.slane %v3639_v38, 4  ;;  %v5104_v25 = vrot.slane %v1176_v16, 9  ;;  %v3657_v8 = vshrl.u32 %v5427_v5, 16  ;;  %v6392_v10 = vld [vmem:[%s6536_s26 + $0x84] sm:$0xff]  }
  0xc9   : > { %v3660_v43 = vshll.u32 %v5427_v5, 16  ;;  %v7363_v20 = vcombine.low %v3597_v21, %v3607_v31  ;;  %v7367_v14 = vsel %vm708_vm0, %v7167_v26, 0  ;;  %v3670_v38 = vshrl.u32 %v7349_v7, 16  ;;  %v6393_v21 = vld [vmem:[%s6536_s26 + $0x90] sm:$0xff]   ;;  %v6449_v18 = vld [vmem:[%s6536_s26 + $0xa0] sm:$0xf] }
  0xca   : > { %v3650_v16 = vrot.slane %v3649_v39, 4  ;;  %v3654_v5 = vrot.slane %v3652_v55, 5  ;;  %v1297_v54 = vrot.slane %v1295_v6, 4  ;;  %v3621_v31 = vsel %vm6562_vm4, %v3616_v12, %v7289_v37 }
  0xcb   : > { %v3631_v26 = vsel %vm6562_vm4, %v3626_v52, %v7341_v50  ;;  %v7382_v39 = vsel %vm6788_vm7, %v5103_v24, %v1288_v30  ;;  %v7386_v55 = vsel %vm6788_vm7, %v1290_v46, %v1291_v61  ;;  %v3645_v37 = vsel %vm6562_vm4, %v3640_v9, %v7316_v35  ;;  %v5433_v30 = vld [vmem:[%s6536_s26 + $0x54] sm:$0xf]  ;;  %v7403_v24 = vld [vmem:[%s6536_s26 + $0x58] sm:$0xf]  ;;  %v7408_v61 = vld [vmem:[%s6536_s26 + $0x90] sm:$0xe] }
  0xcc   : > { %v7399_v12 = vsel %vm6788_vm7, %v5104_v25, %v1295_v6  ;;  %v3659_v50 = vrot.slane %v3657_v8, 4  ;;  %v3662_v52 = vrot.slane %v3660_v43, 5  ;;  %v3672_v46 = vrot.slane %v3670_v38, 4 }
  0xcd   : > { %6003 = vmatmul.mubr.msk.bf16.gmra.mrb[12].mxu0 %vm659_vm3, %v6390_v33  ;;  %v8373_v33 = vcombine.low %v7152_v0, %v7171_v23  ;;  %v6445_v0 = vld [vmem:[%s6536_s26 + $0x8c] sm:$0x1]  ;;  %v3655_v36 = vsel %vm6562_vm4, %v3650_v16, %v3654_v5  ;;  %v3705_v25 = vshrl.u32 %v5433_v30, 16  ;;  %v3708_v8 = vshll.u32 %v5433_v30, 16 }
  0xce   : > { %5849 = vmatmul.mubr.msk.bf16.gmra.mrb[28].mxu1 %vm659_vm3, %v8372_v62  ;;  %6006 = vmatprep.mubr.msk.bf16.mxu0 %vm659_vm3, %v6391_v48  ;;  %v3666_v48 = vshll.u32 %v7349_v7, 16  ;;  %v1298_v23 = vrot.slane %v6445_v0, 5  ;;  %v5430_v62 = vld [vmem:[%s6536_s26 + $0x48] sm:$0xf]  ;;  %v7392_v0 = vld [vmem:[%s6536_s26 + $0x4c] sm:$0xf]  ;;  %v8375_v38 = vcombine.low %v7156_v29, %v7160_v53  ;;  %v7426_v16 = vcombine.low %v3621_v31, %v3631_v26 }
  0xcf   : > { %5854 = vmatprep.mubr.msk.bf16.mxu1 %vm659_vm3, %v8373_v33  ;;  %v7389_v33 = vld [vmem:[%s6536_s26 + $0x44] sm:$0x1]  ;;  %v3681_v27 = vshrl.u32 %v5430_v62, 16  ;;  %v3684_v15 = vshll.u32 %v5430_v62, 16  ;;  %v3690_v6 = vshll.u32 %v7392_v0, 16  ;;  %v3694_v9 = vshrl.u32 %v7392_v0, 16 }
  0xd0   : > { %8374 = vst [vmem:[#allocation8_spill] sm:$0xff] %v7389_v33  ;;  %v7405_v28 = vrot.slane %v3666_v48, 5  ;;  %v7414_v35 = vsel %vm6788_vm7, %v1297_v54, %v1298_v23  ;;  %v3714_v43 = vshll.u32 %v7403_v24, 16  ;;  %v3718_v48 = vshrl.u32 %v7403_v24, 16  ;;  %v5436_v31 = vld [vmem:[%s6536_s26 + $0x60] sm:$0xf] }
  0xd1   : > { %v3676_v5 = vshll.u32 %v7389_v33, 16  ;;  %v5105_v54 = vrot.slane %v7408_v61, 9  ;;  %v8376_v23 = vcombine.low %v7197_v34, %v7213_v4  ;;  %v7437_v29 = vcombine.low %v3645_v37, %v3655_v36  ;;  %v6394_v26 = vld [vmem:[%s6536_s26 + $0x9c] sm:$0xff]   ;;  %v6395_v30 = vld [vmem:[%s6536_s26 + $0xa8] sm:$0xff]  }
  0xd2   : > { %v3663_v53 = vor.u32 %v3662_v52, %v3659_v50  ;;  %v3683_v62 = vrot.slane %v3681_v27, 4  ;;  %v7448_v34 = vrot.slane %v3690_v6, 5  ;;  %v3696_v4 = vrot.slane %v3694_v9, 4  ;;  %v6446_v36 = vld [vmem:[%s8344_s1 + $0x8] sm:$0x3] }
  0xd3   : > { %v3707_v27 = vrot.slane %v3705_v25, 4  ;;  %v3710_v37 = vrot.slane %v3708_v8, 5  ;;  %v7457_v50 = vrot.slane %v3714_v43, 5  ;;  %v3720_v52 = vrot.slane %v3718_v48, 4  ;;  %v6447_v6 = vld [vmem:[%s6536_s26 + $0x94] sm:$0xf] }
  0xd4   : > { %v7463_v9 = vld [vmem:[%s6536_s26 + $0x64] sm:$0xf]  ;;  %v3729_v61 = vshrl.u32 %v5436_v31, 16  ;;  %v7465_v22 = vrot.slane %v3663_v53, 4  ;;  %v1309_v25 = vrot.slane %v6449_v18, 5  ;;  %v3697_v43 = vor.u32 %v3696_v4, %v7448_v34 }
  0xd5   : > { %6007 = vmatmul.mubr.msk.bf16.gmra.mrb[16].mxu0 %vm659_vm3, %v6392_v10  ;;  %8377 = vst [vmem:[#allocation9_spill] sm:$0xff] %v7463_v9  ;;  %v3732_v10 = vshll.u32 %v5436_v31, 16  ;;  %v3711_v31 = vor.u32 %v3710_v37, %v3707_v27  ;;  %v3721_v53 = vor.u32 %v3720_v52, %v7457_v50  ;;  %v8378_v18 = vcombine.low %v7204_v19, %v7217_v58  ;;  %v6396_v37 = vld [vmem:[%s6536_s26 + $0xb4] sm:$0xff]  }
  0xd6   : > { %5855 = vmatmul.mubr.msk.bf16.vlgmr.msra.gmra.mrb[0].mxu1 %vm659_vm3, %v8375_v38  ;;  %6010 = vmatprep.mubr.msk.bf16.mxu0 %vm659_vm3, %v6393_v21  ;;  %v3686_v21 = vrot.slane %v3684_v15, 5  ;;  %v7446_v38 = vld [vmem:[%s6536_s26 + $0x50] sm:$0x1]  ;;  %v7455_v15 = vld [vmem:[%s6536_s26 + $0x5c] sm:$0x1]  ;;  %v8379_v27 = vcombine.low %v7222_v2, %v7226_v1  ;;  %v1311_v52 = vrot.slane %v1309_v25, 4 }
  0xd7   : > { %5887 = vmatpush3.bf16.msra.mxu1 %v7193_v49  ;;  %5858 = vmatprep.mubr.msk.bf16.mxu1 %vm659_vm3, %v8376_v23  ;;  %v3673_v49 = vor.u32 %v3672_v46, %v7405_v28  ;;  %v7459_v46 = vrot.slane %v3676_v5, 5  ;;  %v1302_v23 = vrot.slane %v6447_v6, 5  ;;  %v3700_v48 = vshll.u32 %v7446_v38, 16  ;;  %v1178_v5 = vld [vmem:[%s6536_s26 + $0x9c] sm:$0xe] }
  0xd8   : > { %6353 = vmatprep.subr.msk.bf16.mxu1 %vm708_vm0, %v6446_v36  ;;  %v6448_v36 = vld [vmem:[%s6536_s26 + $0x98] sm:$0x1]  ;;  %v3687_v7 = vor.u32 %v3686_v21, %v3683_v62  ;;  %v3724_v6 = vshll.u32 %v7455_v15, 16  ;;  %v3742_v62 = vshrl.u32 %v7463_v9, 16  ;;  %v3734_v4 = vrot.slane %v3732_v10, 5 }
  0xd9   : > { %v1305_v33 = vrot.slane %v6448_v36, 5  ;;  %v3674_v8 = vrot.slane %v3673_v49, 4  ;;  %v3738_v36 = vshll.u32 %v7463_v9, 16  ;;  %v7484_v21 = vsel %vm6788_vm7, %v5105_v54, %v1302_v23  ;;  %v7495_v2 = vld [vmem:[%s6536_s26 + $0x68] sm:$0x1] }
  0xda   : > { %v3731_v49 = vrot.slane %v3729_v61, 4  ;;  %v3688_v19 = vrot.slane %v3687_v7, 4  ;;  %v5106_v58 = vrot.slane %v1178_v5, 9  ;;  %v3698_v3 = vrot.slane %v3697_v43, 4  ;;  %8380 = vst [vmem:[#allocation10_spill] sm:$0xff] %v7495_v2  ;;  %v6397_v5 = vld [vmem:[%s6536_s26 + $0xc0] sm:$0xff]  }
  0xdb   : > { %v3702_v54 = vrot.slane %v3700_v48, 5  ;;  %v3726_v63 = vrot.slane %v3724_v6, 5  ;;  %v1316_v61 = vrot.slane %v6930_v56, 5  ;;  %v3712_v10 = vrot.slane %v3711_v31, 4  ;;  %v1180_v31 = vld [vmem:[%s6536_s26 + $0xb4] sm:$0xe] }
  0xdc   : > { %v3722_v51 = vrot.slane %v3721_v53, 4  ;;  %v7497_v1 = vrot.slane %v3738_v36, 5  ;;  %v3744_v7 = vrot.slane %v3742_v62, 4  ;;  %v3669_v43 = vsel %vm6562_vm4, %v7465_v22, %v7405_v28  ;;  %v6451_v62 = vld [vmem:[%s6536_s26 + $0xb0] sm:$0x1] }
  0xdd   : > { %6011 = vmatmul.mubr.msk.bf16.gmra.mrb[20].mxu0 %vm659_vm3, %v6394_v26  ;;  %v1304_v26 = vrot.slane %v1302_v23, 4  ;;  %v1179_v23 = vld [vmem:[%s6536_s26 + $0xa8] sm:$0xe]  ;;  %v3679_v48 = vsel %vm6562_vm4, %v3674_v8, %v7459_v46  ;;  %v3735_v6 = vor.u32 %v3734_v4, %v3731_v49  ;;  %v3693_v53 = vsel %vm6562_vm4, %v3688_v19, %v7448_v34  ;;  %v5439_v46 = vld [vmem:[%s6536_s26 + $0x6c] sm:$0xf] }
  0xde   : > { %5859 = vmatmul.mubr.msk.bf16.gmra.mrb[4].mxu1 %vm659_vm3, %v8378_v18  ;;  %6014 = vmatprep.mubr.msk.bf16.mxu0 %vm659_vm3, %v6395_v30  ;;  %v6450_v18 = vld [vmem:[%s6536_s26 + $0xa4] sm:$0x1]  ;;  %v7517_v36 = vsel %vm6788_vm7, %v5106_v58, %v1309_v25  ;;  %v5107_v28 = vrot.slane %v1179_v23, 9  ;;  %v1318_v8 = vrot.slane %v1316_v61, 4  ;;  %v3748_v49 = vshll.u32 %v7495_v2, 16 }
  0xdf   : > { %5862 = vmatprep.mubr.msk.bf16.mxu1 %vm659_vm3, %v8379_v27  ;;  %v1312_v30 = vrot.slane %v6450_v18, 5  ;;  %v7509_v56 = vsel %vm6788_vm7, %v1304_v26, %v1305_v33  ;;  %v3703_v33 = vsel %vm6562_vm4, %v3698_v3, %v3702_v54  ;;  %v1319_v26 = vrot.slane %v6451_v62, 5  ;;  %v5442_v18 = vld [vmem:[%s6536_s26 + $0x78] sm:$0xf]  ;;  %v7572_v54 = vld [vmem:[%s6536_s26 + $0xbc] sm:$0x1] }
  0xe0   : > { %v3717_v34 = vsel %vm6562_vm4, %v3712_v10, %v7457_v50  ;;  %v3727_v25 = vsel %vm6562_vm4, %v3722_v51, %v3726_v63  ;;  %v3745_v4 = vor.u32 %v3744_v7, %v7497_v1  ;;  %v5108_v27 = vrot.slane %v1180_v31, 9  ;;  %v7546_v51 = vld [vmem:[%s6536_s26 + $0x70] sm:$0xf]  ;;  %v7576_v10 = vld [vmem:[%s6536_s26 + $0x7c] sm:$0xf] }
  0xe1   : > { %v7521_v22 = vsel %vm6788_vm7, %v1311_v52, %v1312_v30  ;;  %v8382_v3 = vcombine.low %v7239_v45, %v7243_v59  ;;  %v7542_v19 = vrot.slane %v3735_v6, 4  ;;  %v1323_v50 = vrot.slane %v6954_v42, 5  ;;  %8383 = vst [vmem:[#allocation12_spill] sm:$0xff] %v7546_v51  ;;  %8385 = vst [vmem:[#allocation13_spill] sm:$0xff] %v7576_v10  ;;  %v5445_v7 = vld [vmem:[%s6536_s26 + $0x84] sm:$0xf] }
  0xe2   : > { %8381 = vst [vmem:[#allocation11_spill] sm:$0xff] %v7521_v22  ;;  %v3753_v63 = vshrl.u32 %v5439_v46, 16  ;;  %v8384_v45 = vcombine.low %v7247_v47, %v7274_v41  ;;  %v7554_v58 = vcombine.low %v3693_v53, %v3703_v33  ;;  %v7560_v42 = vsel %vm6788_vm7, %v5107_v28, %v1316_v61  ;;  %v6398_v61 = vld [vmem:[%s6536_s26 + $0xcc] sm:$0xff]   ;;  %v7588_v31 = vld [vmem:[%s6536_s26 + $0x88] sm:$0xf] }
  0xe3   : > { %v7563_v30 = vcombine.low %v3717_v34, %v3727_v25  ;;  %v7567_v47 = vsel %vm6788_vm7, %v1318_v8, %v1319_v26  ;;  %v7569_v41 = vrot.slane %v3748_v49, 5  ;;  %v3762_v6 = vshll.u32 %v7546_v51, 16  ;;  %8386 = vst [vmem:[#allocation14_spill] sm:$0xff] %v7588_v31  ;;  %v5448_v62 = vld [vmem:[%s6536_s26 + $0x90] sm:$0xf] }
  0xe4   : > { %v7594_v28 = vrot.slane %v1323_v50, 4  ;;  %v7596_v33 = vrot.slane %v3753_v63, 4  ;;  %v3766_v8 = vshrl.u32 %v7546_v51, 16  ;;  %v3777_v26 = vshrl.u32 %v5442_v18, 16  ;;  %v7603_v25 = vld [vmem:[%s6536_s26 + $0x94] sm:$0xf] }
  0xe5   : > { %6015 = vmatmul.mubr.msk.bf16.gmra.mrb[24].mxu0 %vm659_vm3, %v6396_v37  ;;  %v7540_v37 = vcombine.low %v3669_v43, %v3679_v48  ;;  %v7584_v43 = vsel %vm6788_vm7, %v5108_v27, %v1323_v50  ;;  %v3756_v48 = vshll.u32 %v5439_v46, 16  ;;  %v3780_v49 = vshll.u32 %v5442_v18, 16  ;;  %8387 = vst [vmem:[#allocation15_spill] sm:$0xff] %v7603_v25  ;;  %v7641_v2 = vld [vmem:[%s6536_s26 + $0x8c] sm:$0x1] }
  0xe6   : > { %5863 = vmatmul.mubr.msk.bf16.gmra.mrb[8].mxu1 %vm659_vm3, %v8382_v3  ;;  %6018 = vmatprep.mubr.msk.bf16.mxu0 %vm659_vm3, %v6397_v5  ;;  %v7580_v5 = vrot.slane %v3745_v4, 4  ;;  %v3786_v46 = vshll.u32 %v7576_v10, 16  ;;  %v3790_v34 = vshrl.u32 %v7576_v10, 16  ;;  %v3801_v4 = vshrl.u32 %v5445_v7, 16 }
  0xe7   : > { %5866 = vmatprep.mubr.msk.bf16.mxu1 %vm659_vm3, %v8384_v45  ;;  %v3804_v27 = vshll.u32 %v5445_v7, 16  ;;  %v3810_v3 = vshll.u32 %v7588_v31, 16  ;;  %v3814_v50 = vshrl.u32 %v7588_v31, 16  ;;  %v7613_v45 = vld [vmem:[%s6536_s26 + $0x74] sm:$0x1]  ;;  %v3758_v18 = vrot.slane %v3756_v48, 5 }
  0xe8   : > { %v3825_v52 = vshrl.u32 %v5448_v62, 16  ;;  %v3828_v53 = vshll.u32 %v5448_v62, 16  ;;  %v8388_v7 = vcombine.low %v7258_v60, %v7283_v44  ;;  %v3768_v59 = vrot.slane %v3766_v8, 4  ;;  %v5451_v48 = vld [vmem:[%s6536_s26 + $0x9c] sm:$0xf] }
  0xe9   : > { %v3834_v63 = vshll.u32 %v7603_v25, 16  ;;  %v3838_v23 = vshrl.u32 %v7603_v25, 16  ;;  %v8389_v62 = vcombine.low %v7298_v17, %v7302_v57  ;;  %v7631_v44 = vld [vmem:[%s6536_s26 + $0x80] sm:$0x1]  ;;  %v3779_v60 = vrot.slane %v3777_v26, 4 }
  0xea   : > { %8390 = vst [vmem:[#allocation16_spill] sm:$0xff] %v7631_v44  ;;  %v3803_v31 = vrot.slane %v3801_v4, 4  ;;  %v3806_v8 = vrot.slane %v3804_v27, 5  ;;  %v7635_v10 = vrot.slane %v3810_v3, 5  ;;  %v3816_v51 = vrot.slane %v3814_v50, 4 }
  0xeb   : > { %v7638_v25 = vld [vmem:[%s6536_s26 + $0xa0] sm:$0xf]  ;;  %v3827_v17 = vrot.slane %v3825_v52, 4  ;;  %v3830_v57 = vrot.slane %v3828_v53, 5  ;;  %v3852_v9 = vshll.u32 %v5451_v48, 16  ;;  %v3759_v26 = vor.u32 %v3758_v18, %v7596_v33 }
  0xec   : > { %v3796_v27 = vshll.u32 %v7631_v44, 16  ;;  %v7650_v3 = vld [vmem:[%s6536_s26 + $0x98] sm:$0x1]  ;;  %v3858_v50 = vshll.u32 %v7638_v25, 16  ;;  %v3862_v52 = vshrl.u32 %v7638_v25, 16  ;;  %v3807_v22 = vor.u32 %v3806_v8, %v3803_v31 }
  0xed   : > { %6019 = vmatmul.mubr.msk.bf16.gmra.mrb[28].mxu0 %vm659_vm3, %v6398_v61  ;;  %v7621_v61 = vrot.slane %v3762_v6, 5  ;;  %v3792_v6 = vrot.slane %v3790_v34, 4  ;;  %v3840_v34 = vrot.slane %v3838_v23, 4  ;;  %v3820_v33 = vshll.u32 %v7641_v2, 16 }
  0xee   : > { %5867 = vmatmul.mubr.msk.bf16.gmra.mrb[12].mxu1 %vm659_vm3, %v8388_v7  ;;  %6024 = vmatprep.mubr.msk.bf16.mxu0 %vm659_vm3, %v7363_v20  ;;  %v3782_v7 = vrot.slane %v3780_v49, 5  ;;  %v7633_v20 = vrot.slane %v3786_v46, 5  ;;  %v3772_v49 = vshll.u32 %v7613_v45, 16  ;;  %v7645_v46 = vrot.slane %v3834_v63, 5 }
  0xef   : > { %5870 = vmatprep.mubr.msk.bf16.mxu1 %vm659_vm3, %v8389_v62  ;;  %v3849_v62 = vshrl.u32 %v5451_v48, 16  ;;  %v3769_v4 = vor.u32 %v3768_v59, %v7621_v61  ;;  %v3817_v23 = vor.u32 %v3816_v51, %v7635_v10  ;;  %v3831_v59 = vor.u32 %v3830_v57, %v3827_v17  ;;  %v7683_v57 = vld [vmem:[%s6536_s26 + $0xa4] sm:$0x1] }
  0xf0   : > { %v3783_v53 = vor.u32 %v3782_v7, %v3779_v60  ;;  %v3793_v48 = vor.u32 %v3792_v6, %v7633_v20  ;;  %v3854_v18 = vrot.slane %v3852_v9, 5  ;;  %v8391_v44 = vcombine.low %v7310_v11, %v7314_v40 }
  0xf1   : > { %v3851_v63 = vrot.slane %v3849_v62, 4  ;;  %v8392_v31 = vrot.slane %v7572_v54, 5  ;;  %v3774_v51 = vrot.slane %v3772_v49, 5  ;;  %v3841_v60 = vor.u32 %v3840_v34, %v7645_v46  ;;  %v7686_v34 = vld [vmem:[%s6536_s26 + $0xac] sm:$0xf] }
  0xf2   : > { %v3844_v9 = vshll.u32 %v7650_v3, 16  ;;  %v8393_v11 = vcombine.low %v7382_v39, %v7386_v55  ;;  %v3760_v40 = vrot.slane %v3759_v26, 4  ;;  %v7679_v54 = vrot.slane %v3858_v50, 5 }
  0xf3   : > { %v3784_v7 = vrot.slane %v3783_v53, 4  ;;  %v3794_v6 = vrot.slane %v3793_v48, 4  ;;  %v3798_v8 = vrot.slane %v3796_v27, 5  ;;  %v3822_v17 = vrot.slane %v3820_v33, 5  ;;  %v7696_v48 = vld [vmem:[%s6536_s26 + $0xb0] sm:$0x1] }
  0xf4   : > { %v3808_v39 = vrot.slane %v3807_v22, 4  ;;  %v3818_v55 = vrot.slane %v3817_v23, 4  ;;  %v3832_v62 = vrot.slane %v3831_v59, 4  ;;  %v3855_v49 = vor.u32 %v3854_v18, %v3851_v63 }
  0xf5   : > { %6025 = vmatmul.mubr.msk.bf16.vlgmr.msra.gmra.mrb[0].mxu0 %vm659_vm3, %v7426_v16  ;;  %v7669_v16 = vsel %vm6788_vm7, %v7594_v28, %v8392_v31  ;;  %v3864_v28 = vrot.slane %v3862_v52, 4  ;;  %v3846_v26 = vrot.slane %v3844_v9, 5  ;;  %v3765_v52 = vsel %vm6562_vm4, %v3760_v40, %v7621_v61 }
  0xf6   : > { %5871 = vmatmul.mubr.msk.bf16.gmra.mrb[16].mxu1 %vm659_vm3, %v8391_v44  ;;  %6057 = vmatpush3.bf16.msra.mxu0 %v7367_v14  ;;  %v3770_v14 = vrot.slane %v3769_v4, 4  ;;  %v5454_v44 = vld [vmem:[%s6536_s26 + $0xa8] sm:$0xf]  ;;  %v3868_v22 = vshll.u32 %v7683_v57, 16  ;;  %v3789_v33 = vsel %vm6562_vm4, %v3784_v7, %v7633_v20  ;;  %v3799_v23 = vsel %vm6562_vm4, %v3794_v6, %v3798_v8 }
  0xf7   : > { %5874 = vmatprep.mubr.msk.bf16.mxu1 %vm659_vm3, %v8393_v11  ;;  %6028 = vmatprep.mubr.msk.bf16.mxu0 %vm659_vm3, %v7437_v29  ;;  %v3842_v29 = vrot.slane %v3841_v60, 4  ;;  %v3873_v4 = vshrl.u32 %v5454_v44, 16  ;;  %v3876_v50 = vshll.u32 %v5454_v44, 16  ;;  %v3865_v53 = vor.u32 %v3864_v28, %v7679_v54  ;;  %v5503_v11 = vld [vmem:[%s6536_s26 + $0x48] sm:$0xe] }
  0xf8   : > { %v3775_v27 = vsel %vm6562_vm4, %v3770_v14, %v3774_v51  ;;  %v3882_v59 = vshll.u32 %v7686_v34, 16  ;;  %v3886_v61 = vshrl.u32 %v7686_v34, 16  ;;  %v3813_v63 = vsel %vm6562_vm4, %v3808_v39, %v7635_v10  ;;  %v7761_v39 = vld [vmem:[%s6536_s26 + $0xb8] sm:$0xf] }
  0xf9   : > { %v3823_v18 = vsel %vm6562_vm4, %v3818_v55, %v3822_v17  ;;  %v3837_v20 = vsel %vm6562_vm4, %v3832_v62, %v7645_v46  ;;  %v3856_v31 = vrot.slane %v3855_v49, 4  ;;  %v8394_v51 = vcombine.low %v7399_v12, %v7414_v35 }
  0xfa   : > { %v3875_v10 = vrot.slane %v3873_v4, 4  ;;  %v3878_v60 = vrot.slane %v3876_v50, 5  ;;  %v3892_v9 = vshll.u32 %v7696_v48, 16  ;;  %v8395_v46 = vcombine.low %v7484_v21, %v7509_v56  ;;  %v5457_v21 = vld [vmem:[%s6536_s26 + $0xb4] sm:$0xf] }
  0xfb   : > { %v5124_v12 = vcombine.low %v7560_v42, %v7567_v47  ;;  %v8396_v35 = vsel %vm6562_vm4, %v7580_v5, %v7569_v41  ;;  %v3866_v14 = vrot.slane %v3865_v53, 4  ;;  %v3870_v28 = vrot.slane %v3868_v22, 5  ;;  %v5505_v4 = vld [vmem:[%s6536_s26 + $0x60] sm:$0xe]  ;;  %v5506_v53 = vld [vmem:[%s6536_s26 + $0x6c] sm:$0xe] }
  0xfc   : > { %v5125_v56 = vcombine.low %v7584_v43, %v7669_v16  ;;  %v7744_v44 = vcombine.low %v3765_v52, %v3775_v27  ;;  %v7746_v42 = vrot.slane %v3882_v59, 5  ;;  %v3888_v47 = vrot.slane %v3886_v61, 4  ;;  %v8405_v16 = vld [vmem:[#allocation4_spill] sm:$0xff] }
  0xfd   : > { %6029 = vmatmul.mubr.msk.bf16.gmra.mrb[4].mxu0 %vm659_vm3, %v7540_v37  ;;  %v3847_v37 = vsel %vm6562_vm4, %v3842_v29, %v3846_v26  ;;  %v7748_v41 = vcombine.low %v3789_v33, %v3799_v23  ;;  %v7750_v5 = vcombine.low %v3813_v63, %v3823_v18  ;;  %v3861_v6 = vsel %vm6562_vm4, %v3856_v31, %v7679_v54  ;;  %v8398_v23 = vld [vmem:[#allocation11_spill] sm:$0xff]  ;;  %v5460_v63 = vld [vmem:[%s6536_s26 + $0xc0] sm:$0xf]  ;;  %v8400_v18 = vld [vmem:[#allocation9_spill] sm:$0xff] }
  0xfe   : > { %5875 = vmatmul.mubr.msk.bf16.gmra.mrb[20].mxu1 %vm659_vm3, %v8394_v51  ;;  %6032 = vmatprep.mubr.msk.bf16.mxu0 %vm659_vm3, %v7554_v58  ;;  %v8397_v58 = vsel %vm6562_vm4, %v7542_v19, %v7497_v1  ;;  %v7752_v7 = vcombine.low %v3837_v20, %v3847_v37  ;;  %v5519_v1 = vrot.slane %v5503_v11, 9  ;;  %v5504_v19 = vld [vmem:[%s6536_s26 + $0x54] sm:$0xe]  ;;  %v3879_v8 = vor.u32 %v3878_v60, %v3875_v10  ;;  %v8401_v31 = vld [vmem:[#allocation10_spill] sm:$0xff] }
  0xff   : > { %5878 = vmatprep.mubr.msk.bf16.mxu1 %vm659_vm3, %v8395_v46  ;;  %v5473_v40 = vcombine.low %v8397_v58, %v8396_v35  ;;  %v7758_v17 = vrot.slane %v3892_v9, 5  ;;  %v3897_v55 = vshrl.u32 %v5457_v21, 16  ;;  %v3871_v62 = vsel %vm6562_vm4, %v3866_v14, %v3870_v28  ;;  %v8402_v9 = vld [vmem:[#allocation12_spill] sm:$0xff]  ;;  %v7810_v35 = vld [vmem:[%s6536_s26 + $0xbc] sm:$0x1] }
 0x100   : > { %v3900_v49 = vshll.u32 %v5457_v21, 16  ;;  %v4356_v29 = vrot.slane %v7392_v0, 5  ;;  %v4359_v26 = vrot.slane %v7446_v38, 5  ;;  %v3889_v50 = vor.u32 %v3888_v47, %v7746_v42  ;;  %v7813_v58 = vld [vmem:[%s6536_s26 + $0xc4] sm:$0xf] }
 0x101   : > { %v5520_v52 = vrot.slane %v5504_v19, 9  ;;  %v4363_v54 = vrot.slane %v7403_v24, 5  ;;  %v4366_v27 = vrot.slane %v7455_v15, 5  ;;  %v3906_v22 = vshll.u32 %v7761_v39, 16  ;;  %v5507_v19 = vld [vmem:[%s6536_s26 + $0x78] sm:$0xe] }
 0x102   : > { %v3910_v33 = vshrl.u32 %v7761_v39, 16  ;;  %v7778_v0 = vsel %vm6788_vm7, %v5519_v1, %v4356_v29  ;;  %v4358_v38 = vrot.slane %v4356_v29, 4  ;;  %v8399_v59 = vcombine.low %v7517_v36, %v8398_v23  ;;  %v8403_v23 = vld [vmem:[#allocation13_spill] sm:$0xff] }
 0x103   : > { %v7785_v24 = vcombine.low %v3861_v6, %v3871_v62  ;;  %v7789_v15 = vsel %vm6788_vm7, %v5520_v52, %v4363_v54  ;;  %v5521_v61 = vrot.slane %v5505_v4, 9  ;;  %v4370_v20 = vrot.slane %v8400_v18, 5  ;;  %v6399_v6 = vld [vmem:[%s6536_s26 + $0xc] sm:$0xff]  }
 0x104   : > { %v7795_v36 = vsel %vm6788_vm7, %v4358_v38, %v4359_v26  ;;  %v4373_v51 = vrot.slane %v8401_v31, 5  ;;  %v5522_v37 = vrot.slane %v5506_v53, 9  ;;  %v4377_v11 = vrot.slane %v8402_v9, 5 }
 0x105   : > { %6033 = vmatmul.mubr.msk.bf16.gmra.mrb[8].mxu0 %vm659_vm3, %v7563_v30  ;;  %v4365_v30 = vrot.slane %v4363_v54, 4  ;;  %v5536_v10 = vcombine.low %v7778_v0, %v7795_v36  ;;  %v4380_v46 = vrot.slane %v7613_v45, 5  ;;  %v7819_v14 = vsel %vm6788_vm7, %v5521_v61, %v4370_v20 }
 0x106   : > { %5879 = vmatmul.mubr.msk.bf16.gmra.mrb[24].mxu1 %vm659_vm3, %v8399_v59  ;;  %6036 = vmatprep.mubr.msk.bf16.mxu0 %vm659_vm3, %v5473_v40  ;;  %v4372_v28 = vrot.slane %v4370_v20, 4  ;;  %v7821_v21 = vrot.slane %v3897_v55, 4  ;;  %v3921_v47 = vshrl.u32 %v5460_v63, 16  ;;  %v7825_v45 = vsel %vm6788_vm7, %v5522_v37, %v4377_v11  ;;  %v5234_v55 = vld [vmem:[%s6536_s26 + $0x78] sm:$0xf]  ;;  %v8404_v59 = vld [vmem:[#allocation16_spill] sm:$0xff] }
 0x107   : > { %5882 = vmatprep.mubr.msk.bf16.mxu1 %vm659_vm3, %v5124_v12  ;;  %v7803_v60 = vsel %vm6788_vm7, %v4365_v30, %v4366_v27  ;;  %v7807_v12 = vrot.slane %v3879_v8, 4  ;;  %v4379_v1 = vrot.slane %v4377_v11, 4  ;;  %v7829_v8 = vrot.slane %v3889_v50, 4 }
 0x108   : > { %v5537_v40 = vcombine.low %v7789_v15, %v7803_v60  ;;  %v7831_v62 = vrot.slane %v3900_v49, 5  ;;  %v3924_v29 = vshll.u32 %v5460_v63, 16  ;;  %v7835_v26 = vsel %vm6788_vm7, %v4372_v28, %v4373_v51  ;;  %v8407_v28 = vld [vmem:[#allocation14_spill] sm:$0xff] }
 0x109   : > { %v7838_v4 = vrot.slane %v3906_v22, 5  ;;  %v7840_v52 = vrot.slane %v3910_v33, 4  ;;  %v5538_v54 = vcombine.low %v7819_v14, %v7835_v26  ;;  %v7846_v27 = vsel %vm6788_vm7, %v4379_v1, %v4380_v46  ;;  %v5508_v33 = vld [vmem:[%s6536_s26 + $0x84] sm:$0xe]  ;;  %v6400_v1 = vld [vmem:[%s6536_s26 + $0x18] sm:$0xff]  }
 0x10a   : > { %v3916_v49 = vshll.u32 %v7810_v35, 16  ;;  %v3930_v50 = vshll.u32 %v7813_v58, 16  ;;  %v5539_v53 = vcombine.low %v7825_v45, %v7846_v27  ;;  %v5523_v22 = vrot.slane %v5507_v19, 9  ;;  %v6462_v60 = vld [vmem:[%s6536_s26 + $0xa0] sm:$0xf] }
 0x10b   : > { %v3923_v38 = vrot.slane %v3921_v47, 4  ;;  %v4387_v30 = vrot.slane %v8404_v59, 5  ;;  %v2246_v61 = vshrl.u32 %v5234_v55, 16  ;;  %v3926_v63 = vrot.slane %v3924_v29, 5  ;;  %v5463_v29 = vld [vmem:[%s6536_s26 + $0xcc] sm:$0xf] }
 0x10c   : > { %v3934_v18 = vshrl.u32 %v7813_v58, 16  ;;  %v2249_v43 = vshll.u32 %v5234_v55, 16  ;;  %v5524_v37 = vrot.slane %v5508_v33, 9  ;;  %v3885_v9 = vsel %vm6562_vm4, %v7807_v12, %v7746_v42  ;;  %v7889_v55 = vld [vmem:[%s6536_s26 + $0xd0] sm:$0xf] }
 0x10d   : > { %6037 = vmatmul.mubr.msk.bf16.gmra.mrb[12].mxu0 %vm659_vm3, %v7744_v44  ;;  %v4384_v44 = vrot.slane %v8403_v23, 5  ;;  %v2248_v51 = vrot.slane %v2246_v61, 4  ;;  %v3903_v11 = vor.u32 %v7831_v62, %v7821_v21  ;;  %v4391_v47 = vrot.slane %v8407_v28, 5  ;;  %v6401_v21 = vld [vmem:[%s6536_s26 + $0x24] sm:$0xff]   ;;  %v6466_v27 = vld [vmem:[%s6536_s26 + $0xac] sm:$0xf] }
 0x10e   : > { %5883 = vmatmul.mubr.msk.bf16.gmra.mrb[28].mxu1 %vm659_vm3, %v5125_v56  ;;  %6040 = vmatprep.mubr.msk.bf16.mxu0 %vm659_vm3, %v7748_v41  ;;  %v8406_v56 = vld [vmem:[#allocation5_spill] sm:$0xff]  ;;  %v2251_v46 = vrot.slane %v2249_v43, 5  ;;  %v3895_v19 = vsel %vm6562_vm4, %v7829_v8, %v7758_v17  ;;  %v4394_v12 = vrot.slane %v7641_v2, 5  ;;  %v7897_v62 = vrot.slane %v3930_v50, 5  ;;  %v5509_v8 = vld [vmem:[%s6536_s26 + $0x90] sm:$0xe] }
 0x10f   : > { %5888 = vmatprep.mubr.msk.bf16.mxu1 %vm659_vm3, %v6399_v6  ;;  %v2268_v41 = vsel %vm6562_vm4, %v8406_v56, %v8405_v16  ;;  %v7871_v20 = vsel %vm6788_vm7, %v5523_v22, %v4384_v44  ;;  %v4386_v31 = vrot.slane %v4384_v44, 4  ;;  %v3913_v6 = vor.u32 %v7840_v52, %v7838_v4  ;;  %v7903_v52 = vld [vmem:[%s6536_s26 + $0xc8] sm:$0x1]  ;;  %v8409_v16 = vld [vmem:[#allocation2_spill] sm:$0xff] }
 0x110   : > { %v3936_v22 = vrot.slane %v3934_v18, 4  ;;  %v2252_v17 = vor.u32 %v2251_v46, %v2248_v51  ;;  %v3918_v23 = vrot.slane %v3916_v49, 5  ;;  %v3927_v44 = vor.u32 %v3926_v63, %v3923_v38  ;;  %v8410_v51 = vld [vmem:[#allocation3_spill] sm:$0xff] }
 0x111   : > { %v7893_v42 = vsel %vm6788_vm7, %v4386_v31, %v4387_v30  ;;  %v7907_v59 = vsel %vm6788_vm7, %v5524_v37, %v4391_v47  ;;  %v4393_v30 = vrot.slane %v4391_v47, 4  ;;  %v3945_v2 = vshrl.u32 %v5463_v29, 16 }
 0x112   : > { %v5540_v33 = vcombine.low %v7871_v20, %v7893_v42  ;;  %v3948_v50 = vshll.u32 %v5463_v29, 16  ;;  %v3954_v61 = vshll.u32 %v7889_v55, 16  ;;  %v2253_v18 = vrot.slane %v2252_v17, 4  ;;  %v6402_v29 = vld [vmem:[%s6536_s26 + $0x30] sm:$0xff]  }
 0x113   : > { %v3958_v49 = vshrl.u32 %v7889_v55, 16  ;;  %v7918_v38 = vsel %vm6788_vm7, %v4393_v30, %v4394_v12  ;;  %v5525_v63 = vrot.slane %v5509_v8, 9  ;;  %v3937_v56 = vor.u32 %v3936_v22, %v7897_v62 }
 0x114   : > { %v3940_v31 = vshll.u32 %v7903_v52, 16  ;;  %v5541_v37 = vcombine.low %v7907_v59, %v7918_v38  ;;  %v5479_v46 = vcombine.low %v3885_v9, %v3895_v19  ;;  %v3904_v28 = vrot.slane %v3903_v11, 4  ;;  %v5510_v11 = vld [vmem:[%s6536_s26 + $0x9c] sm:$0xe] }
 0x115   : > { %6041 = vmatmul.mubr.msk.bf16.gmra.mrb[16].mxu0 %vm659_vm3, %v7750_v5  ;;  %v8408_v5 = vld [vmem:[#allocation15_spill] sm:$0xff]  ;;  %v3914_v47 = vrot.slane %v3913_v6, 4  ;;  %v3928_v12 = vrot.slane %v3927_v44, 4  ;;  %v4401_v8 = vrot.slane %v7650_v3, 5  ;;  %v3947_v30 = vrot.slane %v3945_v2, 4  ;;  %v6403_v19 = vld [vmem:[%s6536_s26 + $0x3c] sm:$0xff]  }
 0x116   : > { %5889 = vmatmul.mubr.msk.bf16.vlgmr.msra.gmra.mrb[0].mxu1 %vm659_vm3, %v6400_v1  ;;  %6044 = vmatprep.mubr.msk.bf16.mxu0 %vm659_vm3, %v7752_v7  ;;  %v4398_v43 = vrot.slane %v8408_v5, 5  ;;  %v2258_v7 = vsel %vm6562_vm4, %v2253_v18, %v8410_v51  ;;  %v3950_v18 = vrot.slane %v3948_v50, 5  ;;  %v7941_v5 = vrot.slane %v3954_v61, 5 }
 0x117   : > { %6091 = vmatpush3.bf16.msra.mxu1 %v8409_v16  ;;  %5892 = vmatprep.mubr.msk.bf16.mxu1 %vm659_vm3, %v6401_v21  ;;  %v7930_v1 = vcombine.low %v2258_v7, %v2268_v41  ;;  %v7934_v21 = vld [vmem:[%s6536_s26 + $0xd4] sm:$0x1]  ;;  %v3960_v9 = vrot.slane %v3958_v49, 4  ;;  %v3938_v41 = vrot.slane %v3937_v56, 4  ;;  %v3942_v6 = vrot.slane %v3940_v31, 5 }
 0x118   : > { %v7938_v22 = vsel %vm6788_vm7, %v5525_v63, %v4398_v43  ;;  %v4400_v17 = vrot.slane %v4398_v43, 4  ;;  %v3909_v63 = vsel %vm6562_vm4, %v3904_v28, %v7838_v4  ;;  %v3919_v2 = vsel %vm6562_vm4, %v3914_v47, %v3918_v23  ;;  %v6453_v16 = vld [vmem:[%s6536_s26 + $0x1c] sm:$0xf]  ;;  %v5511_v28 = vld [vmem:[%s6536_s26 + $0xa8] sm:$0xe] }
 0x119   : > { %v3964_v50 = vshll.u32 %v7934_v21, 16  ;;  %v5526_v61 = vrot.slane %v5510_v11, 9  ;;  %v4405_v49 = vrot.slane %v7638_v25, 5  ;;  %v3933_v4 = vsel %vm6562_vm4, %v3928_v12, %v7897_v62  ;;  %v5499_v62 = vld [vmem:[%s6536_s26 + $0x18] sm:$0xe]  ;;  %v6404_v47 = vld [vmem:[%s6536_s26 + $0x48] sm:$0xff]  }
 0x11a   : > { %v7947_v44 = vsel %vm6788_vm7, %v4400_v17, %v4401_v8  ;;  %v3961_v43 = vor.u32 %v3960_v9, %v7941_v5  ;;  %v4408_v23 = vrot.slane %v7683_v57, 5  ;;  %v3943_v25 = vsel %vm6562_vm4, %v3938_v41, %v3942_v6  ;;  %v6454_v11 = vld [vmem:[%s6536_s26 + $0x20] sm:$0x1] }
 0x11b   : > { %v5542_v3 = vcombine.low %v7938_v22, %v7947_v44  ;;  %v4328_v56 = vrot.slane %v6453_v16, 5  ;;  %v7973_v31 = vsel %vm6788_vm7, %v5526_v61, %v4405_v49  ;;  %v4407_v51 = vrot.slane %v4405_v49, 4  ;;  %v5512_v49 = vld [vmem:[%s6536_s26 + $0xb4] sm:$0xe] }
 0x11c   : > { %v5480_v7 = vcombine.low %v3909_v63, %v3919_v2  ;;  %v3962_v17 = vrot.slane %v3961_v43, 4  ;;  %v5527_v41 = vrot.slane %v5511_v28, 9  ;;  %v4412_v6 = vrot.slane %v7686_v34, 5  ;;  %v5500_v2 = vld [vmem:[%s6536_s26 + $0x24] sm:$0xe] }
 0x11d   : > { %6045 = vmatmul.mubr.msk.bf16.gmra.mrb[20].mxu0 %vm659_vm3, %v7785_v24  ;;  %v3951_v24 = vor.u32 %v3950_v18, %v3947_v30  ;;  %v7978_v57 = vsel %vm6788_vm7, %v4407_v51, %v4408_v23  ;;  %v6405_v30 = vld [vmem:[%s6536_s26 + $0x54] sm:$0xff]   ;;  %v5515_v18 = vrot.slane %v5499_v62, 9  ;;  %v4330_v9 = vrot.slane %v4328_v56, 4  ;;  %v6457_v28 = vld [vmem:[%s6536_s26 + $0x2c] sm:$0x1] }
 0x11e   : > { %5893 = vmatmul.mubr.msk.bf16.gmra.mrb[4].mxu1 %vm659_vm3, %v6402_v29  ;;  %6048 = vmatprep.mubr.msk.bf16.mxu0 %vm659_vm3, %v5479_v46  ;;  %v3966_v46 = vrot.slane %v3964_v50, 5  ;;  %v5481_v29 = vcombine.low %v3933_v4, %v3943_v25  ;;  %v5543_v8 = vcombine.low %v7973_v31, %v7978_v57  ;;  %v4415_v63 = vrot.slane %v7696_v48, 5  ;;  %v6455_v50 = vld [vmem:[%s6536_s26 + $0x28] sm:$0xf]  ;;  %v5501_v25 = vld [vmem:[%s6536_s26 + $0x30] sm:$0xe] }
 0x11f   : > { %5896 = vmatprep.mubr.msk.bf16.mxu1 %vm659_vm3, %v6403_v19  ;;  %v3952_v12 = vrot.slane %v3951_v24, 4  ;;  %v4331_v19 = vrot.slane %v6454_v11, 5  ;;  %v4335_v61 = vrot.slane %v6455_v50, 5  ;;  %v8001_v48 = vsel %vm6788_vm7, %v5527_v41, %v4412_v6  ;;  %v6407_v11 = vld [vmem:[%s6536_s26 + $0x6c] sm:$0xff]   ;;  %v8411_v41 = vld [vmem:[#allocation6_spill] sm:$0xff] }
 0x120   : > { %v3967_v34 = vsel %vm6562_vm4, %v3962_v17, %v3966_v46  ;;  %v4414_v24 = vrot.slane %v4412_v6, 4  ;;  %v4329_v43 = vsel %vm6788_vm7, %v5515_v18, %v4328_v56  ;;  %v5516_v51 = vrot.slane %v5500_v2, 9  ;;  %v5513_v50 = vld [vmem:[%s6536_s26 + $0xc0] sm:$0xe]  ;;  %v6471_v31 = vld [vmem:[%s6536_s26 + $0xc8] sm:$0x1] }
 0x121   : > { %v3957_v4 = vsel %vm6562_vm4, %v3952_v12, %v7941_v5  ;;  %v4332_v23 = vsel %vm6788_vm7, %v4330_v9, %v4331_v19  ;;  %v6456_v5 = vld [vmem:[%s6536_s26 + $0x34] sm:$0xf]  ;;  %v6406_v12 = vld [vmem:[%s6536_s26 + $0x60] sm:$0xff]   ;;  %v5517_v18 = vrot.slane %v5501_v25, 9  ;;  %v4422_v9 = vrot.slane %v7810_v35, 5 }
 0x122   : > { %v4342_v16 = vrot.slane %v6456_v5, 5  ;;  %v8012_v62 = vsel %vm6788_vm7, %v4414_v24, %v4415_v63  ;;  %v5482_v46 = vcombine.low %v3957_v4, %v3967_v34  ;;  %v5532_v17 = vcombine.low %v4329_v43, %v4332_v23  ;;  %v5502_v24 = vld [vmem:[%s6536_s26 + $0x3c] sm:$0xe] }
 0x123   : > { %v5544_v56 = vcombine.low %v8001_v48, %v8012_v62  ;;  %v4345_v6 = vrot.slane %v8411_v41, 5  ;;  %v4336_v35 = vsel %vm6788_vm7, %v5516_v51, %v4335_v61  ;;  %v5529_v5 = vrot.slane %v5513_v50, 9 }
 0x124   : > { %v4344_v19 = vrot.slane %v4342_v16, 4  ;;  %v4343_v23 = vsel %vm6788_vm7, %v5517_v18, %v4342_v16  ;;  %v4429_v51 = vrot.slane %v7903_v52, 5  ;;  %v2409_v57 = vshll.u32 %v6471_v31, 16 }
 0x125   : > { %6049 = vmatmul.mubr.msk.bf16.gmra.mrb[24].mxu0 %vm659_vm3, %v5480_v7  ;;  %v5528_v7 = vrot.slane %v5512_v49, 9 }
 0x126   : > { %5897 = vmatmul.mubr.msk.bf16.gmra.mrb[8].mxu1 %vm659_vm3, %v6404_v47  ;;  %6052 = vmatprep.mubr.msk.bf16.mxu0 %vm659_vm3, %v5481_v29  ;;  %v4338_v47 = vrot.slane %v6457_v28, 5  ;;  %v4419_v29 = vrot.slane %v7761_v39, 5  ;;  %v8412_v39 = vld [vmem:[#allocation7_spill] sm:$0xff]  ;;  %v4346_v25 = vsel %vm6788_vm7, %v4344_v19, %v4345_v6  ;;  %v5518_v28 = vrot.slane %v5502_v24, 9 }
 0x127   : > { %5900 = vmatprep.mubr.msk.bf16.mxu1 %vm659_vm3, %v6405_v30  ;;  %v4337_v30 = vrot.slane %v4335_v61, 4  ;;  %v4349_v49 = vrot.slane %v8412_v39, 5  ;;  %v4426_v61 = vrot.slane %v7813_v58, 5  ;;  %v6458_v39 = vld [vmem:[%s6536_s26 + $0x70] sm:$0xf]  ;;  %v4433_v24 = vrot.slane %v7889_v55, 5 }
 0x128   : > { %v8024_v63 = vsel %vm6788_vm7, %v5528_v7, %v4419_v29  ;;  %v4421_v2 = vrot.slane %v4419_v29, 4  ;;  %v5231_v7 = vld [vmem:[%s6536_s26 + $0x6c] sm:$0xf]  ;;  %v8413_v29 = vld [vmem:[#allocation8_spill] sm:$0xff] }
 0x129   : > { %v4339_v34 = vsel %vm6788_vm7, %v4337_v30, %v4338_v47  ;;  %v4351_v47 = vrot.slane %v4349_v49, 4  ;;  %v6408_v30 = vld [vmem:[%s6536_s26 + $0x78] sm:$0xff]   ;;  %v8055_v16 = vsel %vm6788_vm7, %v5529_v5, %v4426_v61  ;;  %v4428_v18 = vrot.slane %v4426_v61, 4 }
 0x12a   : > { %v8031_v4 = vsel %vm6788_vm7, %v4421_v2, %v4422_v9  ;;  %v5534_v9 = vcombine.low %v4343_v23, %v4346_v25  ;;  %v2222_v19 = vshrl.u32 %v5231_v7, 16  ;;  %v2225_v41 = vshll.u32 %v5231_v7, 16 }
 0x12b   : > { %v5545_v43 = vcombine.low %v8024_v63, %v8031_v4  ;;  %v8060_v58 = vsel %vm6788_vm7, %v4428_v18, %v4429_v51  ;;  %v4350_v6 = vsel %vm6788_vm7, %v5518_v28, %v4349_v49  ;;  %v4436_v49 = vrot.slane %v7934_v21, 5  ;;  %v6410_v51 = vld [vmem:[%s6536_s26 + $0x90] sm:$0xff]   ;;  %v6411_v21 = vld [vmem:[%s6536_s26 + $0x9c] sm:$0xff]  }
 0x12c   : > { %v5546_v50 = vcombine.low %v8055_v16, %v8060_v58  ;;  %v2224_v23 = vrot.slane %v2222_v19, 4  ;;  %v2227_v25 = vrot.slane %v2225_v41, 5  ;;  %v4435_v7 = vrot.slane %v4433_v24, 4 }
 0x12d   : > { %6053 = vmatmul.mubr.msk.bf16.gmra.mrb[28].mxu0 %vm659_vm3, %v5482_v46  ;;  %v5533_v46 = vcombine.low %v4336_v35, %v4339_v34  ;;  %v2231_v35 = vshll.u32 %v6458_v39, 16  ;;  %v2235_v34 = vshrl.u32 %v6458_v39, 16 }
 0x12e   : > { %5901 = vmatmul.mubr.msk.bf16.gmra.mrb[12].mxu1 %vm659_vm3, %v6406_v12  ;;  %6058 = vmatprep.mubr.msk.bf16.mxu0 %vm659_vm3, %v5532_v17  ;;  %v4352_v12 = vrot.slane %v8413_v29, 5  ;;  %v5514_v17 = vld [vmem:[%s6536_s26 + $0xcc] sm:$0xe]  ;;  %v8082_v55 = vsel %vm6788_vm7, %v4435_v7, %v4436_v49 }
 0x12f   : > { %5904 = vmatprep.mubr.msk.bf16.mxu1 %vm659_vm3, %v6407_v11  ;;  %v6409_v11 = vld [vmem:[%s6536_s26 + $0x84] sm:$0xff]   ;;  %v5530_v52 = vrot.slane %v5514_v17, 9  ;;  %v2237_v28 = vrot.slane %v2235_v34, 4  ;;  %v6459_v17 = vld [vmem:[%s6536_s26 + $0x74] sm:$0x1] }
 0x130   : > { %v4353_v2 = vsel %vm6788_vm7, %v4351_v47, %v4352_v12  ;;  %v5237_v47 = vld [vmem:[%s6536_s26 + $0x84] sm:$0xf]  ;;  %v2228_v12 = vor.u32 %v2227_v25, %v2224_v23  ;;  %v6413_v34 = vld [vmem:[%s6536_s26 + $0xb4] sm:$0xff]  }
 0x131   : > { %v8077_v5 = vsel %vm6788_vm7, %v5530_v52, %v4433_v24  ;;  %v5535_v61 = vcombine.low %v4350_v6, %v4353_v2  ;;  %v2273_v18 = vshll.u32 %v5237_v47, 16  ;;  %v5240_v6 = vld [vmem:[%s6536_s26 + $0x90] sm:$0xf]  ;;  %v6412_v2 = vld [vmem:[%s6536_s26 + $0xa8] sm:$0xff]  }
 0x132   : > { %v5547_v29 = vcombine.low %v8077_v5, %v8082_v55  ;;  %v2229_v52 = vrot.slane %v2228_v12, 4  ;;  %v2294_v23 = vshrl.u32 %v5240_v6, 16  ;;  %v2297_v25 = vshll.u32 %v5240_v6, 16 }
 0x133   : > { %v2327_v12 = vshll.u32 %v6462_v60, 16 }
 0x134   : > { %v2299_v14 = vrot.slane %v2297_v25, 5  ;;  %v6465_v25 = vld [vmem:[%s6536_s26 + $0xa4] sm:$0x1] }
 0x135   : > { %6059 = vmatmul.mubr.msk.bf16.vlgmr.msra.gmra.mrb[0].mxu0 %vm659_vm3, %v5533_v46  ;;  %v2233_v46 = vrot.slane %v2231_v35, 5  ;;  %v5243_v35 = vld [vmem:[%s6536_s26 + $0x9c] sm:$0xf]  ;;  %v8124_v6 = vrot.slane %v2327_v12, 5 }
 0x136   : > { %5905 = vmatmul.mubr.msk.bf16.gmra.mrb[16].mxu1 %vm659_vm3, %v6408_v30  ;;  %6062 = vmatprep.mubr.msk.bf16.mxu0 %vm659_vm3, %v5534_v9  ;;  %v2241_v30 = vshll.u32 %v6459_v17, 16  ;;  %v2270_v9 = vshrl.u32 %v5237_v47, 16  ;;  %v2321_v47 = vshll.u32 %v5243_v35, 16  ;;  %v6463_v17 = vld [vmem:[%s6536_s26 + $0x8c] sm:$0x1] }
 0x137   : > { %5908 = vmatprep.mubr.msk.bf16.mxu1 %vm659_vm3, %v6409_v11  ;;  %v2238_v13 = vor.u32 %v2237_v28, %v2233_v46  ;;  %v6460_v11 = vld [vmem:[%s6536_s26 + $0x88] sm:$0xf]  ;;  %v2234_v7 = vsel %vm6562_vm4, %v2229_v52, %v2233_v46 }
 0x138   : > { %v2279_v19 = vshll.u32 %v6460_v11, 16  ;;  %v2283_v41 = vshrl.u32 %v6460_v11, 16  ;;  %v2243_v0 = vrot.slane %v2241_v30, 5  ;;  %v2272_v36 = vrot.slane %v2270_v9, 4 }
 0x139   : > { %v2239_v39 = vrot.slane %v2238_v13, 4  ;;  %v2289_v30 = vshll.u32 %v6463_v17, 16  ;;  %v2296_v9 = vrot.slane %v2294_v23, 4  ;;  %v2323_v11 = vrot.slane %v2321_v47, 5 }
 0x13a   : > { %v8101_v24 = vrot.slane %v2279_v19, 5  ;;  %v2285_v49 = vrot.slane %v2283_v41, 4  ;;  %v6414_v19 = vld [vmem:[%s6536_s26 + $0xc0] sm:$0xff]  }
 0x13b   : > { %v2244_v46 = vsel %vm6562_vm4, %v2239_v39, %v2243_v0  ;;  %v5246_v39 = vld [vmem:[%s6536_s26 + $0xa8] sm:$0xf] }
 0x13c   : > { %v2286_v13 = vor.u32 %v2285_v49, %v8101_v24  ;;  %v5264_v41 = vcombine.low %v2234_v7, %v2244_v46  ;;  %v2337_v7 = vshll.u32 %v6465_v25, 16  ;;  %v2345_v45 = vshll.u32 %v5246_v39, 16 }
 0x13d   : > { %6063 = vmatmul.mubr.msk.bf16.gmra.mrb[4].mxu0 %vm659_vm3, %v5535_v61  ;;  %v6461_v61 = vld [vmem:[%s6536_s26 + $0x94] sm:$0xf] }
 0x13e   : > { %5909 = vmatmul.mubr.msk.bf16.gmra.mrb[20].mxu1 %vm659_vm3, %v6410_v51  ;;  %6066 = vmatprep.mubr.msk.bf16.mxu0 %vm659_vm3, %v5536_v10  ;;  %v2275_v10 = vrot.slane %v2273_v18, 5  ;;  %v2303_v51 = vshll.u32 %v6461_v61, 16  ;;  %v2307_v28 = vshrl.u32 %v6461_v61, 16  ;;  %v2287_v0 = vrot.slane %v2286_v13, 4 }
 0x13f   : > { %5912 = vmatprep.mubr.msk.bf16.mxu1 %vm659_vm3, %v6411_v21  ;;  %v2318_v21 = vshrl.u32 %v5243_v35, 16  ;;  %v6464_v35 = vld [vmem:[%s6536_s26 + $0x98] sm:$0x1]  ;;  %v2342_v61 = vshrl.u32 %v5246_v39, 16  ;;  %v5252_v39 = vld [vmem:[%s6536_s26 + $0xc0] sm:$0xf] }
 0x140   : > { %v2276_v15 = vor.u32 %v2275_v10, %v2272_v36  ;;  %v8121_v26 = vrot.slane %v2303_v51, 5  ;;  %v2291_v36 = vrot.slane %v2289_v30, 5  ;;  %v2300_v10 = vor.u32 %v2299_v14, %v2296_v9  ;;  %v5249_v51 = vld [vmem:[%s6536_s26 + $0xb4] sm:$0xf] }
 0x141   : > { %v2320_v18 = vrot.slane %v2318_v21, 4  ;;  %v2355_v21 = vshrl.u32 %v6466_v27, 16  ;;  %v2366_v20 = vshrl.u32 %v5249_v51, 16  ;;  %v2369_v42 = vshll.u32 %v5249_v51, 16 }
 0x142   : > { %v2277_v52 = vrot.slane %v2276_v15, 4  ;;  %v2292_v46 = vsel %vm6562_vm4, %v2287_v0, %v2291_v36  ;;  %v2301_v15 = vrot.slane %v2300_v10, 4  ;;  %v2339_v30 = vrot.slane %v2337_v7, 5 }
 0x143   : > { %v2324_v23 = vor.u32 %v2323_v11, %v2320_v18  ;;  %v2344_v9 = vrot.slane %v2342_v61, 4  ;;  %v2357_v11 = vrot.slane %v2355_v21, 4  ;;  %v6470_v61 = vld [vmem:[%s6536_s26 + $0xbc] sm:$0x1] }
 0x144   : > { %v2282_v47 = vsel %vm6562_vm4, %v2277_v52, %v8101_v24  ;;  %v2306_v0 = vsel %vm6562_vm4, %v2301_v15, %v8121_v26  ;;  %v2385_v22 = vshll.u32 %v6470_v61, 16 }
 0x145   : > { %6067 = vmatmul.mubr.msk.bf16.gmra.mrb[8].mxu0 %vm659_vm3, %v5537_v40  ;;  %v2331_v40 = vshrl.u32 %v6462_v60, 16  ;;  %v2325_v17 = vrot.slane %v2324_v23, 4  ;;  %v5266_v24 = vcombine.low %v2282_v47, %v2292_v46 }
 0x146   : > { %5913 = vmatmul.mubr.msk.bf16.gmra.mrb[24].mxu1 %vm659_vm3, %v6412_v2  ;;  %6070 = vmatprep.mubr.msk.bf16.mxu0 %vm659_vm3, %v5538_v54  ;;  %v2309_v54 = vrot.slane %v2307_v28, 4 }
 0x147   : > { %5916 = vmatprep.mubr.msk.bf16.mxu1 %vm659_vm3, %v6413_v34  ;;  %v2333_v2 = vrot.slane %v2331_v40, 4  ;;  %v2313_v34 = vshll.u32 %v6464_v35, 16  ;;  %v2330_v10 = vsel %vm6562_vm4, %v2325_v17, %v8124_v6  ;;  %v2411_v17 = vrot.slane %v2409_v57, 5 }
 0x148   : > { %v2310_v49 = vor.u32 %v2309_v54, %v8121_v26  ;;  %v2347_v54 = vrot.slane %v2345_v45, 5  ;;  %v6468_v26 = vld [vmem:[%s6536_s26 + $0xb0] sm:$0x1] }
 0x149   : > { %v2334_v28 = vor.u32 %v2333_v2, %v8124_v6  ;;  %v2315_v60 = vrot.slane %v2313_v34, 5  ;;  %v2361_v35 = vshll.u32 %v6468_v26, 16  ;;  %v2390_v34 = vshrl.u32 %v5252_v39, 16 }
 0x14a   : > { %v2311_v13 = vrot.slane %v2310_v49, 4  ;;  %v2348_v38 = vor.u32 %v2347_v54, %v2344_v9  ;;  %v2393_v6 = vshll.u32 %v5252_v39, 16  ;;  %v6469_v49 = vld [vmem:[%s6536_s26 + $0xc4] sm:$0xf] }
 0x14b   : > { %v2335_v14 = vrot.slane %v2334_v28, 4  ;;  %v2399_v23 = vshll.u32 %v6469_v49, 16  ;;  %v2403_v25 = vshrl.u32 %v6469_v49, 16  ;;  %v2363_v45 = vrot.slane %v2361_v35, 5 }
 0x14c   : > { %v2316_v36 = vsel %vm6562_vm4, %v2311_v13, %v2315_v60  ;;  %v2349_v51 = vrot.slane %v2348_v38, 4  ;;  %v2387_v60 = vrot.slane %v2385_v22, 5 }
 0x14d   : > { %6071 = vmatmul.mubr.msk.bf16.gmra.mrb[12].mxu0 %vm659_vm3, %v5539_v53  ;;  %v2351_v53 = vshll.u32 %v6466_v27, 16  ;;  %v2340_v59 = vsel %vm6562_vm4, %v2335_v14, %v2339_v30  ;;  %v5267_v44 = vcombine.low %v2306_v0, %v2316_v36  ;;  %v2392_v27 = vrot.slane %v2390_v34, 4 }
 0x14e   : > { %5917 = vmatmul.mubr.msk.bf16.gmra.mrb[28].mxu1 %vm659_vm3, %v6414_v19  ;;  %6074 = vmatprep.mubr.msk.bf16.mxu0 %vm659_vm3, %v5540_v33  ;;  %v6467_v33 = vld [vmem:[%s6536_s26 + $0xb8] sm:$0xf]  ;;  %v2368_v19 = vrot.slane %v2366_v20, 4  ;;  %v2401_v21 = vrot.slane %v2399_v23, 5  ;;  %v2405_v47 = vrot.slane %v2403_v25, 4 }
 0x14f   : > { %5938 = vmatprep.mubr.msk.bf16.mxu1 %vm659_vm3, %v5264_v41  ;;  %v2375_v12 = vshll.u32 %v6467_v33, 16  ;;  %v2379_v40 = vshrl.u32 %v6467_v33, 16  ;;  %v2353_v18 = vrot.slane %v2351_v53, 5  ;;  %v2371_v41 = vrot.slane %v2369_v42, 5 }
 0x150   : > { %v2395_v53 = vrot.slane %v2393_v6, 5 }
 0x151   : > { %v2377_v52 = vrot.slane %v2375_v12, 5  ;;  %v2381_v2 = vrot.slane %v2379_v40, 4  ;;  %v2354_v20 = vsel %vm6562_vm4, %v2349_v51, %v2353_v18  ;;  %v2406_v12 = vor.u32 %v2405_v47, %v2401_v21 }
 0x152   : > { %v2396_v33 = vor.u32 %v2395_v53, %v2392_v27 }
 0x153   : > { %v2382_v7 = vor.u32 %v2381_v2, %v2377_v52  ;;  %v2407_v13 = vrot.slane %v2406_v12, 4  ;;  %v8230_v2 = vld [vmem:[%s8345_s2] ss:$0 sm:$0xff] }
 0x154   : > { %v2397_v40 = vrot.slane %v2396_v33, 4 }
 0x155   : > { %6075 = vmatmul.mubr.msk.bf16.gmra.mrb[16].mxu0 %vm659_vm3, %v5541_v37  ;;  %v2358_v37 = vor.u32 %v2357_v11, %v2353_v18  ;;  %v2383_v15 = vrot.slane %v2382_v7, 4  ;;  %v2412_v9 = vsel %vm6562_vm4, %v2407_v13, %v2411_v17 }
 0x156   : > { %5939 = vmatmul.mubr.msk.bf16.vlgmr.msra.gmra.mrb[16].mxu1 %vm659_vm3, %v7930_v1  ;;  %6078 = vmatprep.mubr.msk.bf16.mxu0 %vm659_vm3, %v5542_v3  ;;  %v2372_v1 = vor.u32 %v2371_v41, %v2368_v19  ;;  %v5268_v3 = vcombine.low %v2330_v10, %v2340_v59  ;;  %v2402_v30 = vsel %vm6562_vm4, %v2397_v40, %v2401_v21 }
 0x157   : > { %5942 = vmatprep.mubr.msk.bf16.mxu1 %vm659_vm3, %v5266_v24  ;;  %v2359_v28 = vrot.slane %v2358_v37, 4  ;;  %v2388_v48 = vsel %vm6562_vm4, %v2383_v15, %v2387_v60  ;;  %v5271_v14 = vcombine.low %v2402_v30, %v2412_v9 }
 0x158   : > { %v2373_v46 = vrot.slane %v2372_v1, 4 }
 0x159   : > { %v2364_v42 = vsel %vm6562_vm4, %v2359_v28, %v2363_v45 }
 0x15a   : > { %v5269_v62 = vcombine.low %v2354_v20, %v2364_v42 }
 0x15d   : > { %6079 = vmatmul.mubr.msk.bf16.gmra.mrb[20].mxu0 %vm659_vm3, %v5543_v8  ;;  %v2378_v8 = vsel %vm6562_vm4, %v2373_v46, %v2377_v52 }
 0x15e   : > { %5943 = vmatmul.mubr.msk.bf16.gmra.mrb[20].mxu1 %vm659_vm3, %v5267_v44  ;;  %6082 = vmatprep.mubr.msk.bf16.mxu0 %vm659_vm3, %v5544_v56  ;;  %v5270_v56 = vcombine.low %v2378_v8, %v2388_v48 }
 0x15f   : > { %5946 = vmatprep.mubr.msk.bf16.mxu1 %vm659_vm3, %v5268_v3 }
 0x165   : > { %6083 = vmatmul.mubr.msk.bf16.gmra.mrb[24].mxu0 %vm659_vm3, %v5545_v43 }
 0x166   : > { %5947 = vmatmul.mubr.msk.bf16.gmra.mrb[24].mxu1 %vm659_vm3, %v5269_v62  ;;  %6086 = vmatprep.mubr.msk.bf16.mxu0 %vm659_vm3, %v5546_v50 }
 0x167   : > { %5950 = vmatprep.mubr.msk.bf16.mxu1 %vm659_vm3, %v5270_v56 }
 0x16d   : > { %6087 = vmatmul.mubr.msk.bf16.gmra.mrb[28].mxu0 %vm659_vm3, %v5547_v29 }
 0x16e   : > { %5951 = vmatmul.mubr.msk.bf16.gmra.mrb[28].mxu1 %vm659_vm3, %v5271_v14 }
 0x1e9   : > { %v5890_v63 = vpop.f32.mrb[0].mxu1 }
 0x1ea   : > { %v1822_v4 = vpop.f32.mrb[1].mxu1 }
 0x1eb   : > { %v5891_v43 = vpop.f32.mrb[2].mxu1 }
 0x1ec   : > { %v1825_v16 = vpop.f32.mrb[3].mxu1 }
 0x1f1   : > { %v5894_v58 = vpop.f32.mrb[4].mxu1 }
 0x1f2   : > { %v1838_v50 = vpop.f32.mrb[5].mxu1 }
 0x1f3   : > { %v5895_v54 = vpop.f32.mrb[6].mxu1 }
 0x1f4   : > { %v1841_v18 = vpop.f32.mrb[7].mxu1 }
 0x1f9   : > { %v5898_v11 = vpop.f32.mrb[8].mxu1 }
 0x1fa   : > { %v8212_v32 = vpop.f32.mrb[9].mxu1 }
 0x1fb   : > { %v8214_v24 = vpop.f32.mrb[10].mxu1 }
 0x1fc   : > { %v8216_v19 = vpop.f32.mrb[11].mxu1 }
 0x201   : > { %v8219_v5 = vpop.f32.mrb[12].mxu1 }
 0x202   : > { %v8221_v55 = vpop.f32.mrb[13].mxu1 }
 0x203   : > { %v8223_v29 = vpop.f32.mrb[14].mxu1 }
 0x204   : > { %v8225_v41 = vpop.f32.mrb[15].mxu1 }
 0x208   : > { %v6060_v52 = vpop.f32.mrb[0].mxu0 }
 0x209   : > { %v6092_v39 = vadd.f32 %v6060_v52, %v5890_v63  ;;  %v4573_v0 = vpop.f32.mrb[1].mxu0 }
 0x20a   : > { %v6093_v36 = vadd.f32 %v4573_v0, %v1822_v4  ;;  %v6061_v10 = vpop.f32.mrb[2].mxu0 }
 0x20b   : > { %v4741_v59 = vadd.f32 %v6092_v39, %v8230_v2  ;;  %v6094_v38 = vadd.f32 %v6061_v10, %v5891_v43  ;;  %v4576_v37 = vpop.f32.mrb[3].mxu0 }
 0x20c   : > { %v4739_v26 = vadd.f32 %v6093_v36, %v8230_v2  ;;  %v6095_v35 = vadd.f32 %v4576_v37, %v1825_v16 }
 0x20d   : > { %v4773_v34 = vmax.f32 %v4741_v59, 0.0  ;;  %v4742_v6 = vadd.f32 %v6094_v38, %v8230_v2 }
 0x20e   : > { %v4771_v49 = vmax.f32 %v4739_v26, 0.0  ;;  %v4740_v23 = vadd.f32 %v6095_v35, %v8230_v2 }
 0x20f   : > { %v5601_v25 = vpack.c.bf16 %v4773_v34, %v4773_v34  ;;  %v4774_v1 = vmax.f32 %v4742_v6, 0.0 }
 0x210   : > { %v5599_v7 = vpack.c.bf16 %v4771_v49, %v4771_v49  ;;  %v4772_v61 = vmax.f32 %v4740_v23, 0.0  ;;  %v6064_v22 = vpop.f32.mrb[4].mxu0 }
 0x211   : > { %4934 = vst.msk [vmem:[%s8238_s21 + $0x8] sm:$0xf] %vm4931_vm8, %v5601_v25  ;;  %v5602_v44 = vpack.c.bf16 %v4774_v1, %v4774_v1  ;;  %v6096_v3 = vadd.f32 %v6064_v22, %v5894_v58  ;;  %v4589_v51 = vpop.f32.mrb[5].mxu0 }
 0x212   : > { %4932 = vst.msk [vmem:[%s8238_s21] sm:$0xf] %vm4931_vm8, %v5599_v7  ;;  %v5600_v28 = vpack.c.bf16 %v4772_v61, %v4772_v61  ;;  %v6097_v45 = vadd.f32 %v4589_v51, %v1838_v50  ;;  %v6065_v27 = vpop.f32.mrb[6].mxu0 }
 0x213   : > { %4935 = vst.msk [vmem:[%s8238_s21 + $0xc] sm:$0xf] %vm4931_vm8, %v5602_v44  ;;  %v4745_v53 = vadd.f32 %v6096_v3, %v8230_v2  ;;  %v6098_v21 = vadd.f32 %v6065_v27, %v5895_v54  ;;  %v4592_v47 = vpop.f32.mrb[7].mxu0 }
 0x214   : > { %4933 = vst.msk [vmem:[%s8238_s21 + $0x4] sm:$0xf] %vm4931_vm8, %v5600_v28  ;;  %v4743_v46 = vadd.f32 %v6097_v45, %v8230_v2  ;;  %v6099_v15 = vadd.f32 %v4592_v47, %v1841_v18 }
 0x215   : > { %v4777_v60 = vmax.f32 %v4745_v53, 0.0  ;;  %v4746_v20 = vadd.f32 %v6098_v21, %v8230_v2 }
 0x216   : > { %v4775_v42 = vmax.f32 %v4743_v46, 0.0  ;;  %v4744_v33 = vadd.f32 %v6099_v15, %v8230_v2 }
 0x217   : > { %v5605_v12 = vpack.c.bf16 %v4777_v60, %v4777_v60  ;;  %v4778_v31 = vmax.f32 %v4746_v20, 0.0 }
 0x218   : > { %v5603_v57 = vpack.c.bf16 %v4775_v42, %v4775_v42  ;;  %v4776_v8 = vmax.f32 %v4744_v33, 0.0  ;;  %v6068_v48 = vpop.f32.mrb[8].mxu0 }
 0x219   : > { %4938 = vst.msk [vmem:[%s8238_s21 + $0x18] sm:$0xf] %vm4931_vm8, %v5605_v12  ;;  %v5606_v62 = vpack.c.bf16 %v4778_v31, %v4778_v31  ;;  %v6100_v56 = vadd.f32 %v6068_v48, %v5898_v11  ;;  %v4605_v40 = vpop.f32.mrb[9].mxu0 }
 0x21a   : > { %4936 = vst.msk [vmem:[%s8238_s21 + $0x10] sm:$0xf] %vm4931_vm8, %v5603_v57  ;;  %v5604_v13 = vpack.c.bf16 %v4776_v8, %v4776_v8  ;;  %v6101_v17 = vadd.f32 %v4605_v40, %v8212_v32  ;;  %v6069_v30 = vpop.f32.mrb[10].mxu0 }
 0x21b   : > { %4939 = vst.msk [vmem:[%s8238_s21 + $0x1c] sm:$0xf] %vm4931_vm8, %v5606_v62  ;;  %v4749_v9 = vadd.f32 %v6100_v56, %v8230_v2  ;;  %v6102_v14 = vadd.f32 %v6069_v30, %v8214_v24  ;;  %v4608_v63 = vpop.f32.mrb[11].mxu0 }
 0x21c   : > { %4937 = vst.msk [vmem:[%s8238_s21 + $0x14] sm:$0xf] %vm4931_vm8, %v5604_v13  ;;  %v4747_v4 = vadd.f32 %v6101_v17, %v8230_v2  ;;  %v6103_v43 = vadd.f32 %v4608_v63, %v8216_v19 }
 0x21d   : > { %v4781_v16 = vmax.f32 %v4749_v9, 0.0  ;;  %v4750_v58 = vadd.f32 %v6102_v14, %v8230_v2 }
 0x21e   : > { %v4779_v50 = vmax.f32 %v4747_v4, 0.0  ;;  %v4748_v54 = vadd.f32 %v6103_v43, %v8230_v2 }
 0x21f   : > { %v5609_v18 = vpack.c.bf16 %v4781_v16, %v4781_v16  ;;  %v4782_v11 = vmax.f32 %v4750_v58, 0.0 }
 0x220   : > { %v5607_v32 = vpack.c.bf16 %v4779_v50, %v4779_v50  ;;  %v4780_v24 = vmax.f32 %v4748_v54, 0.0  ;;  %v6072_v52 = vpop.f32.mrb[12].mxu0 }
 0x221   : > { %4942 = vst.msk [vmem:[%s8238_s21 + $0x28] sm:$0xf] %vm4931_vm8, %v5609_v18  ;;  %v5610_v39 = vpack.c.bf16 %v4782_v11, %v4782_v11  ;;  %v6104_v0 = vadd.f32 %v6072_v52, %v8219_v5  ;;  %v4621_v36 = vpop.f32.mrb[13].mxu0 }
 0x222   : > { %4940 = vst.msk [vmem:[%s8238_s21 + $0x20] sm:$0xf] %vm4931_vm8, %v5607_v32  ;;  %v5608_v19 = vpack.c.bf16 %v4780_v24, %v4780_v24  ;;  %v6105_v10 = vadd.f32 %v4621_v36, %v8221_v55  ;;  %v6073_v59 = vpop.f32.mrb[14].mxu0 }
 0x223   : > { %4943 = vst.msk [vmem:[%s8238_s21 + $0x2c] sm:$0xf] %vm4931_vm8, %v5610_v39  ;;  %v4753_v38 = vadd.f32 %v6104_v0, %v8230_v2  ;;  %v6106_v37 = vadd.f32 %v6073_v59, %v8223_v29  ;;  %v4624_v26 = vpop.f32.mrb[15].mxu0 }
 0x224   : > { %4941 = vst.msk [vmem:[%s8238_s21 + $0x24] sm:$0xf] %vm4931_vm8, %v5608_v19  ;;  %v4751_v5 = vadd.f32 %v6105_v10, %v8230_v2  ;;  %v6107_v35 = vadd.f32 %v4624_v26, %v8225_v41 }
 0x225   : > { %v4785_v34 = vmax.f32 %v4753_v38, 0.0  ;;  %v4754_v6 = vadd.f32 %v6106_v37, %v8230_v2 }
 0x226   : > { %v4783_v55 = vmax.f32 %v4751_v5, 0.0  ;;  %v4752_v49 = vadd.f32 %v6107_v35, %v8230_v2 }
 0x227   : > { %v5613_v23 = vpack.c.bf16 %v4785_v34, %v4785_v34  ;;  %v4786_v25 = vmax.f32 %v4754_v6, 0.0 }
 0x228   : > { %v5611_v1 = vpack.c.bf16 %v4783_v55, %v4783_v55  ;;  %v4784_v29 = vmax.f32 %v4752_v49, 0.0  ;;  %v6076_v7 = vpop.f32.mrb[16].mxu0 }
 0x229   : > { %4946 = vst.msk [vmem:[%s8238_s21 + $0x38] sm:$0xf] %vm4931_vm8, %v5613_v23  ;;  %v5614_v61 = vpack.c.bf16 %v4786_v25, %v4786_v25  ;;  %v5940_v22 = vpop.f32.mrb[16].mxu1  ;;  %v4637_v44 = vpop.f32.mrb[17].mxu0 }
 0x22a   : > { %4944 = vst.msk [vmem:[%s8238_s21 + $0x30] sm:$0xf] %vm4931_vm8, %v5611_v1  ;;  %v5612_v41 = vpack.c.bf16 %v4784_v29, %v4784_v29  ;;  %v6108_v3 = vadd.f32 %v6076_v7, %v5940_v22  ;;  %v2612_v51 = vpop.f32.mrb[17].mxu1  ;;  %v6077_v28 = vpop.f32.mrb[18].mxu0 }
 0x22b   : > { %4947 = vst.msk [vmem:[%s8238_s21 + $0x3c] sm:$0xf] %vm4931_vm8, %v5614_v61  ;;  %v6109_v45 = vadd.f32 %v4637_v44, %v2612_v51  ;;  %v5941_v27 = vpop.f32.mrb[18].mxu1  ;;  %v4640_v53 = vpop.f32.mrb[19].mxu0 }
 0x22c   : > { %4945 = vst.msk [vmem:[%s8238_s21 + $0x34] sm:$0xf] %vm4931_vm8, %v5612_v41  ;;  %v4757_v21 = vadd.f32 %v6108_v3, %v8230_v2  ;;  %v6110_v47 = vadd.f32 %v6077_v28, %v5941_v27  ;;  %v2615_v46 = vpop.f32.mrb[19].mxu1 }
 0x22d   : > { %v4755_v15 = vadd.f32 %v6109_v45, %v8230_v2  ;;  %v6111_v60 = vadd.f32 %v4640_v53, %v2615_v46 }
 0x22e   : > { %v4789_v20 = vmax.f32 %v4757_v21, 0.0  ;;  %v4758_v42 = vadd.f32 %v6110_v47, %v8230_v2 }
 0x22f   : > { %v4787_v33 = vmax.f32 %v4755_v15, 0.0  ;;  %v4756_v12 = vadd.f32 %v6111_v60, %v8230_v2 }
 0x230   : > { %v5617_v31 = vpack.c.bf16 %v4789_v20, %v4789_v20  ;;  %v4790_v57 = vmax.f32 %v4758_v42, 0.0  ;;  %v6080_v8 = vpop.f32.mrb[20].mxu0 }
 0x231   : > { %v5615_v48 = vpack.c.bf16 %v4787_v33, %v4787_v33  ;;  %v4788_v62 = vmax.f32 %v4756_v12, 0.0  ;;  %v5944_v56 = vpop.f32.mrb[20].mxu1  ;;  %v4653_v40 = vpop.f32.mrb[21].mxu0 }
 0x232   : > { %4950 = vst.msk [vmem:[%s8238_s21 + $0x48] sm:$0xf] %vm4931_vm8, %v5617_v31  ;;  %v5618_v13 = vpack.c.bf16 %v4790_v57, %v4790_v57  ;;  %v6112_v17 = vadd.f32 %v6080_v8, %v5944_v56  ;;  %v2628_v30 = vpop.f32.mrb[21].mxu1  ;;  %v6081_v9 = vpop.f32.mrb[22].mxu0 }
 0x233   : > { %4948 = vst.msk [vmem:[%s8238_s21 + $0x40] sm:$0xf] %vm4931_vm8, %v5615_v48  ;;  %v5616_v14 = vpack.c.bf16 %v4788_v62, %v4788_v62  ;;  %v6113_v63 = vadd.f32 %v4653_v40, %v2628_v30  ;;  %v5945_v4 = vpop.f32.mrb[22].mxu1  ;;  %v4656_v43 = vpop.f32.mrb[23].mxu0 }
 0x234   : > { %4951 = vst.msk [vmem:[%s8238_s21 + $0x4c] sm:$0xf] %vm4931_vm8, %v5618_v13  ;;  %v4761_v16 = vadd.f32 %v6112_v17, %v8230_v2  ;;  %v6114_v58 = vadd.f32 %v6081_v9, %v5945_v4  ;;  %v2631_v50 = vpop.f32.mrb[23].mxu1 }
 0x235   : > { %4949 = vst.msk [vmem:[%s8238_s21 + $0x44] sm:$0xf] %vm4931_vm8, %v5616_v14  ;;  %v4759_v54 = vadd.f32 %v6113_v63, %v8230_v2  ;;  %v6115_v18 = vadd.f32 %v4656_v43, %v2631_v50 }
 0x236   : > { %v4793_v11 = vmax.f32 %v4761_v16, 0.0  ;;  %v4762_v32 = vadd.f32 %v6114_v58, %v8230_v2 }
 0x237   : > { %v4791_v24 = vmax.f32 %v4759_v54, 0.0  ;;  %v4760_v52 = vadd.f32 %v6115_v18, %v8230_v2 }
 0x238   : > { %v5621_v39 = vpack.c.bf16 %v4793_v11, %v4793_v11  ;;  %v4794_v0 = vmax.f32 %v4762_v32, 0.0  ;;  %v6084_v36 = vpop.f32.mrb[24].mxu0 }
 0x239   : > { %v5619_v19 = vpack.c.bf16 %v4791_v24, %v4791_v24  ;;  %v4792_v10 = vmax.f32 %v4760_v52, 0.0  ;;  %v5948_v59 = vpop.f32.mrb[24].mxu1  ;;  %v4669_v38 = vpop.f32.mrb[25].mxu0 }
 0x23a   : > { %4954 = vst.msk [vmem:[%s8238_s21 + $0x58] sm:$0xf] %vm4931_vm8, %v5621_v39  ;;  %v5622_v37 = vpack.c.bf16 %v4794_v0, %v4794_v0  ;;  %v6116_v26 = vadd.f32 %v6084_v36, %v5948_v59  ;;  %v2644_v5 = vpop.f32.mrb[25].mxu1  ;;  %v6085_v35 = vpop.f32.mrb[26].mxu0 }
 0x23b   : > { %4952 = vst.msk [vmem:[%s8238_s21 + $0x50] sm:$0xf] %vm4931_vm8, %v5619_v19  ;;  %v5620_v34 = vpack.c.bf16 %v4792_v10, %v4792_v10  ;;  %v6117_v6 = vadd.f32 %v4669_v38, %v2644_v5  ;;  %v5949_v55 = vpop.f32.mrb[26].mxu1  ;;  %v4672_v49 = vpop.f32.mrb[27].mxu0 }
 0x23c   : > { %4955 = vst.msk [vmem:[%s8238_s21 + $0x5c] sm:$0xf] %vm4931_vm8, %v5622_v37  ;;  %v4765_v23 = vadd.f32 %v6116_v26, %v8230_v2  ;;  %v6118_v25 = vadd.f32 %v6085_v35, %v5949_v55  ;;  %v2647_v1 = vpop.f32.mrb[27].mxu1 }
 0x23d   : > { %4953 = vst.msk [vmem:[%s8238_s21 + $0x54] sm:$0xf] %vm4931_vm8, %v5620_v34  ;;  %v4763_v29 = vadd.f32 %v6117_v6, %v8230_v2  ;;  %v6119_v7 = vadd.f32 %v4672_v49, %v2647_v1 }
 0x23e   : > { %v4797_v61 = vmax.f32 %v4765_v23, 0.0  ;;  %v4766_v22 = vadd.f32 %v6118_v25, %v8230_v2 }
 0x23f   : > { %v4795_v44 = vmax.f32 %v4763_v29, 0.0  ;;  %v4764_v41 = vadd.f32 %v6119_v7, %v8230_v2 }
 0x240   : > { %v5625_v3 = vpack.c.bf16 %v4797_v61, %v4797_v61  ;;  %v4798_v51 = vmax.f32 %v4766_v22, 0.0  ;;  %v6088_v28 = vpop.f32.mrb[28].mxu0 }
 0x241   : > { %v5623_v45 = vpack.c.bf16 %v4795_v44, %v4795_v44  ;;  %v4796_v27 = vmax.f32 %v4764_v41, 0.0  ;;  %v5952_v53 = vpop.f32.mrb[28].mxu1  ;;  %v4685_v21 = vpop.f32.mrb[29].mxu0 }
 0x242   : > { %4958 = vst.msk [vmem:[%s8238_s21 + $0x68] sm:$0xf] %vm4931_vm8, %v5625_v3  ;;  %v5626_v47 = vpack.c.bf16 %v4798_v51, %v4798_v51  ;;  %v6120_v46 = vadd.f32 %v6088_v28, %v5952_v53  ;;  %v2660_v15 = vpop.f32.mrb[29].mxu1  ;;  %v6089_v60 = vpop.f32.mrb[30].mxu0 }
 0x243   : > { %4956 = vst.msk [vmem:[%s8238_s21 + $0x60] sm:$0xf] %vm4931_vm8, %v5623_v45  ;;  %v5624_v20 = vpack.c.bf16 %v4796_v27, %v4796_v27  ;;  %v6121_v42 = vadd.f32 %v4685_v21, %v2660_v15  ;;  %v5953_v33 = vpop.f32.mrb[30].mxu1  ;;  %v4688_v12 = vpop.f32.mrb[31].mxu0 }
 0x244   : > { %4959 = vst.msk [vmem:[%s8238_s21 + $0x6c] sm:$0xf] %vm4931_vm8, %v5626_v47  ;;  %v4769_v31 = vadd.f32 %v6120_v46, %v8230_v2  ;;  %v6122_v57 = vadd.f32 %v6089_v60, %v5953_v33  ;;  %v2663_v8 = vpop.f32.mrb[31].mxu1 }
 0x245   : > { %4957 = vst.msk [vmem:[%s8238_s21 + $0x64] sm:$0xf] %vm4931_vm8, %v5624_v20  ;;  %v4767_v48 = vadd.f32 %v6121_v42, %v8230_v2  ;;  %v6123_v62 = vadd.f32 %v4688_v12, %v2663_v8 }
 0x246   : > { %v4801_v56 = vmax.f32 %v4769_v31, 0.0  ;;  %v4770_v40 = vadd.f32 %v6122_v57, %v8230_v2 }
 0x247   : > { %v4799_v13 = vmax.f32 %v4767_v48, 0.0  ;;  %v4768_v17 = vadd.f32 %v6123_v62, %v8230_v2 }
 0x248   : > { %v5629_v30 = vpack.c.bf16 %v4801_v56, %v4801_v56  ;;  %v4802_v9 = vmax.f32 %v4770_v40, 0.0 }
 0x249   : > { %v5627_v14 = vpack.c.bf16 %v4799_v13, %v4799_v13  ;;  %v4800_v63 = vmax.f32 %v4768_v17, 0.0 }
 0x24a   : > { %4962 = vst.msk [vmem:[%s8238_s21 + $0x78] sm:$0xf] %vm4931_vm8, %v5629_v30  ;;  %v5630_v4 = vpack.c.bf16 %v4802_v9, %v4802_v9 }
 0x24b   : > { %4960 = vst.msk [vmem:[%s8238_s21 + $0x70] sm:$0xf] %vm4931_vm8, %v5627_v14  ;;  %v5628_v43 = vpack.c.bf16 %v4800_v63, %v4800_v63 }
 0x24c   : > { %4963 = vst.msk [vmem:[%s8238_s21 + $0x7c] sm:$0xf] %vm4931_vm8, %v5630_v4 }
 0x24d   : > { %4961 = vst.msk [vmem:[%s8238_s21 + $0x74] sm:$0xf] %vm4931_vm8, %v5628_v43 }
 0x24e PF: > { %s13_s12 = sadd.s32 1, %s6478_s12  }
 0x24f   : > { %p10_p5 = scmp.ge.s32.totalorder %s13_s12, 4  }
 0x251   :  { %12 = sbr.rel (!%p10_p5) target bundleno = 1 (0x1), region = 72 }

</bundles_post_ra>
